<compile_context>
chip_gen: v7x
topology: tpu7x:2x2x1
jax: 0.10.0
libtpu: 0.0.40
codegen_flags: <defaults>
</compile_context>

<pallas_src>
import math
import functools

import jax
import jax.numpy as jnp
from jax.experimental import pallas as pl
from jax.experimental.pallas import tpu as pltpu

# ---- small, module-consistent shapes ----
B, S, H = 2, 8, 32            # batch, seq, hidden_size (d_model)
BB = B                        # batch block; at B=2 do NOT split across cores
NUM_LAYERS = 2
VOCAB, NB_SPECIAL = 10, 3
V = VOCAB + NB_SPECIAL        # self.vocab_size = vocab_size + nb_special_tokens
PAD_TOKEN = 0


# ---------------- fused kernel ----------------

def fused_encoder_kernel(ids_ref, tv_ref, emb_ref, tw_ref, tb_ref,
                         wih_ref, whh_ref, b_ref,
                         out_ref, hc_ref,
                         *, hidden, seq, layers, bb, scale):
    h_ = hidden
    n = bb * seq
    v = emb_ref.shape[0]

    # --- fused embedding gather: one-hot (N, V) @ (V, H) on the (idle) MXU ---
    onehot = (ids_ref[...] ==
              jax.lax.broadcasted_iota(jnp.int32, (n, v), 1)).astype(jnp.float32)
    emb = jnp.dot(onehot, emb_ref[...], preferred_element_type=jnp.float32)   # (N, H)
    # time attribute Linear(1,H) + scale; dropout(p=0) == identity.
    x = (emb + tv_ref[...] * tw_ref[...] + tb_ref[...]) * scale               # (N, H)

    # Resident weights (constant index maps -> loaded once per block).
    wih = [wih_ref[l] for l in range(layers)]          # (H, 4H) each
    whh = [whh_ref[l] for l in range(layers)]          # (H, 4H) each
    bias = [b_ref[l] for l in range(layers)]           # (1, 4H) each

    # Layer-0 input-to-hidden matmul hoisted out of the recurrence:
    # one (BB*S, H) x (H, 4H) MXU push; only h@W_hh stays on the serial path.
    gx0 = jnp.dot(x, wih[0], preferred_element_type=jnp.float32) + bias[0]    # (N, 4H)
    gx0 = gx0.reshape(bb, seq, 4 * h_)   # static per-step sublane extract below

    def lstm_step(gates, c_prev):
        # Single full-width (4H = 128 lane) EUP push per step; i/f/o pre-activations
        # were pre-scaled by 0.5 so sigmoid(z) = 0.5*tanh(z/2)+0.5 (VPU fma, free slot).
        th = jnp.tanh(gates)
        i = 0.5 * th[:, 0 * h_:1 * h_] + 0.5
        f = 0.5 * th[:, 1 * h_:2 * h_] + 0.5
        g = th[:, 2 * h_:3 * h_]
        o = 0.5 * th[:, 3 * h_:4 * h_] + 0.5
        c = f * c_prev + i * g
        h = o * jnp.tanh(c)
        return h, c

    hs = [jnp.zeros((bb, h_), jnp.float32) for _ in range(layers)]
    cs = [jnp.zeros((bb, h_), jnp.float32) for _ in range(layers)]
    outs = []

    # Wavefront over (layer, t): iteration t does (layer0, t) then (layer1, t); the
    # unrolled dataflow lets layer-1's EUP/VPU overlap layer-0's next MXU push.
    for t in range(seq):
        gates0 = gx0[:, t, :] + jnp.dot(hs[0], whh[0],
                                        preferred_element_type=jnp.float32)
        hs[0], cs[0] = lstm_step(gates0, cs[0])
        x_t = hs[0]
        for l in range(1, layers):
            # Per-step input-to-hidden for upper layers (no whole-sequence dependency).
            gates = (jnp.dot(x_t, wih[l], preferred_element_type=jnp.float32)
                     + jnp.dot(hs[l], whh[l], preferred_element_type=jnp.float32)
                     + bias[l])
            hs[l], cs[l] = lstm_step(gates, cs[l])
            x_t = hs[l]
        outs.append(x_t)                 # stays in vregs; no per-step VMEM store

    # Single lane-dense stores (off the recurrence path).
    out_ref[...] = jnp.concatenate(outs, axis=-1)                       # (BB, S*H)
    hc_ref[...] = jnp.concatenate(
        [jnp.concatenate([hs[l], cs[l]], axis=-1) for l in range(layers)],
        axis=-1)                                                        # (BB, L*2*H)


# ---------------- wrapper ----------------

def sequential_encoder_forward(prep, act_ids, time_vals):
    # Only FREE reshapes on the input side (no gather / transpose dispatches).
    ids_flat = act_ids.reshape(B * S, 1)          # batch-major flat, row = b*S + t
    tv_flat = time_vals.reshape(B * S, 1)

    kernel = functools.partial(fused_encoder_kernel, hidden=H, seq=S,
                               layers=NUM_LAYERS, bb=BB, scale=math.sqrt(H))
    # VMEM footprint: resident weights ~128 KB + a few KB of activations; far under the
    # 32 MiB scoped default (64 MiB physical per TC on v7x) -- no limit override needed.
    out_flat, hc_flat = pl.pallas_call(
        kernel,
        grid=(B // BB,),
        in_specs=[
            pl.BlockSpec((BB * S, 1), lambda b: (b, 0)),                 # activity ids
            pl.BlockSpec((BB * S, 1), lambda b: (b, 0)),                 # time attribute
            pl.BlockSpec((V, H), lambda b: (0, 0)),                      # embedding table
            pl.BlockSpec((1, H), lambda b: (0, 0)),                      # time Linear W row
            pl.BlockSpec((1, H), lambda b: (0, 0)),                      # time Linear b row
            pl.BlockSpec((NUM_LAYERS, H, 4 * H), lambda b: (0, 0, 0)),   # W_ih^T (pre-scaled)
            pl.BlockSpec((NUM_LAYERS, H, 4 * H), lambda b: (0, 0, 0)),   # W_hh^T (pre-scaled)
            pl.BlockSpec((NUM_LAYERS, 1, 4 * H), lambda b: (0, 0, 0)),   # b_ih+b_hh (pre-scaled)
        ],
        out_specs=(
            pl.BlockSpec((BB, S * H), lambda b: (b, 0)),                 # lane-dense output
            pl.BlockSpec((BB, NUM_LAYERS * 2 * H), lambda b: (b, 0)),    # packed (h_n, c_n)
        ),
        out_shape=(jax.ShapeDtypeStruct((B, S * H), jnp.float32),
                   jax.ShapeDtypeStruct((B, NUM_LAYERS * 2 * H), jnp.float32)),
        compiler_params=pltpu.CompilerParams(
            # "parallel" lets v7x split the batch across its 2 TCs once BB=B//2 is set
            # at larger B (keep BB=B at B=2: per-core launch cost > whole kernel).
            dimension_semantics=("parallel",)),
    )(ids_flat, tv_flat, prep["emb"], prep["time_w_row"], prep["time_b_row"],
      prep["wih_t"], prep["whh_t"], prep["bias"])

    out = out_flat.reshape(B, S, H)
    hc = hc_flat.reshape(B, NUM_LAYERS, 2, H)
    hn = jnp.transpose(hc[:, :, 0, :], (1, 0, 2))
    cn = jnp.transpose(hc[:, :, 1, :], (1, 0, 2))
    return out, (hn, cn)


# ---------------- parameter init (PyTorch layout) + one-time preprocessing ----------------

def init_params():
    ks = jax.random.split(jax.random.PRNGKey(0), 8)
    n = lambda k, s: 0.1 * jax.random.normal(k, s, jnp.float32)
    emb = n(ks[0], (V, H)).at[PAD_TOKEN].set(0.0)                 # padding_idx row = 0
    return dict(
        emb=emb,
        time_w=n(ks[1], (H, 1)), time_b=n(ks[2], (H,)),           # nn.Linear(1, H)
        wih=n(ks[3], (NUM_LAYERS, 4 * H, H)),
        whh=n(ks[4], (NUM_LAYERS, 4 * H, H)),
        bih=n(ks[5], (NUM_LAYERS, 4 * H)),
        bhh=n(ks[6], (NUM_LAYERS, 4 * H)),
    )


def prepare_params(params):
    # One-time preprocessing (not per forward call):
    #  * transpose LSTM weights to (L, H, 4H), sum the two biases,
    #  * pre-scale the i/f/o gate columns (PyTorch order i,f,g,o) by 0.5 so the kernel
    #    can use sigmoid(z) = 0.5*tanh(z/2)+0.5 with a single tanh per step.
    #    The g-gate columns stay unscaled (plain tanh).  Gate math stays f32 (v5e EUP/VPU).
    half = jnp.full((H,), 0.5, jnp.float32)
    one = jnp.ones((H,), jnp.float32)
    gate_scale = jnp.concatenate([half, half, one, half])         # (4H,) for [i,f,g,o]
    return dict(
        emb=params["emb"],
        time_w_row=params["time_w"].reshape(1, H),
        time_b_row=params["time_b"].reshape(1, H),
        wih_t=jnp.transpose(params["wih"], (0, 2, 1)) * gate_scale,       # (L, H, 4H)
        whh_t=jnp.transpose(params["whh"], (0, 2, 1)) * gate_scale,       # (L, H, 4H)
        bias=((params["bih"] + params["bhh"]) * gate_scale
              ).reshape(NUM_LAYERS, 1, 4 * H),
    )


# ---------------- pure-JAX reference (unscaled params, standard formulation) ----------------

def reference_forward(params, act_ids, time_vals):
    emb = params["emb"][act_ids[:, :, 0]]
    x = (emb + time_vals * params["time_w"].reshape(1, 1, H)
         + params["time_b"].reshape(1, 1, H)) * math.sqrt(H)
    hs, cs = [], []
    for layer in range(NUM_LAYERS):
        wih, whh = params["wih"][layer], params["whh"][layer]
        b = params["bih"][layer] + params["bhh"][layer]

        def step(carry, xt):
            hp, cp = carry
            gates = xt @ wih.T + hp @ whh.T + b
            i = jax.nn.sigmoid(gates[:, :H])
            f = jax.nn.sigmoid(gates[:, H:2 * H])
            g = jnp.tanh(gates[:, 2 * H:3 * H])
            o = jax.nn.sigmoid(gates[:, 3 * H:])
            cn = f * cp + i * g
            hn = o * jnp.tanh(cn)
            return (hn, cn), hn

        (hf, cf), ys = jax.lax.scan(step,
                                    (jnp.zeros((B, H)), jnp.zeros((B, H))),
                                    jnp.transpose(x, (1, 0, 2)))
        x = jnp.transpose(ys, (1, 0, 2))
        hs.append(hf)
        cs.append(cf)
    return x, (jnp.stack(hs), jnp.stack(cs))


if __name__ == "__main__":
    params = init_params()
    prep = prepare_params(params)

    kx = jax.random.split(jax.random.PRNGKey(0), 2)
    # x = (activity indices (B,S,1) int, time attribute (B,S,1) float)
    act_ids = jax.random.randint(kx[0], (B, S, 1), 0, V, dtype=jnp.int32)
    time_vals = jax.random.uniform(kx[1], (B, S, 1), dtype=jnp.float32)

    fwd = jax.jit(sequential_encoder_forward)
    out, (hn, cn) = fwd(prep, act_ids, time_vals)
    out = jax.block_until_ready(out)
    hn = jax.block_until_ready(hn)
    cn = jax.block_until_ready(cn)

    ref_out, (ref_hn, ref_cn) = reference_forward(params, act_ids, time_vals)
    assert out.shape == (B, S, H)
    assert hn.shape == (NUM_LAYERS, B, H) and cn.shape == (NUM_LAYERS, B, H)
    assert jnp.allclose(out, ref_out, atol=2e-3, rtol=2e-3)
    assert jnp.allclose(hn, ref_hn, atol=2e-3, rtol=2e-3)
    assert jnp.allclose(cn, ref_cn, atol=2e-3, rtol=2e-3)
    print("KERNEL_OK")
</pallas_src>

<mosaic_0001>
module attributes {stable_mosaic.version = 11 : i64} {
  func.func @fused_encoder_kernel(%arg0: i32, %arg1: memref<16x1xi32, #tpu.memory_space<vmem>>, %arg2: memref<16x1xf32, #tpu.memory_space<vmem>>, %arg3: memref<13x32xf32, #tpu.memory_space<vmem>>, %arg4: memref<1x32xf32, #tpu.memory_space<vmem>>, %arg5: memref<1x32xf32, #tpu.memory_space<vmem>>, %arg6: memref<2x32x128xf32, #tpu.memory_space<vmem>>, %arg7: memref<2x32x128xf32, #tpu.memory_space<vmem>>, %arg8: memref<2x1x128xf32, #tpu.memory_space<vmem>>, %arg9: memref<2x256xf32, #tpu.memory_space<vmem>>, %arg10: memref<2x128xf32, #tpu.memory_space<vmem>>) attributes {dimension_semantics = [#tpu.dimension_semantics<parallel>], iteration_bounds = array<i64: 1>, scalar_prefetch = 0 : i64, scratch_operands = 0 : i64, tpu.core_type = #tpu.core_type<tc>, window_params = [{transform_indices = @transform_0, window_bounds = array<i64: 16, 1>}, {transform_indices = @transform_1, window_bounds = array<i64: 16, 1>}, {pipeline_mode = #tpu.pipeline_mode<synchronous>, transform_indices = @transform_2, window_bounds = array<i64: 13, 32>}, {pipeline_mode = #tpu.pipeline_mode<synchronous>, transform_indices = @transform_3, window_bounds = array<i64: 1, 32>}, {pipeline_mode = #tpu.pipeline_mode<synchronous>, transform_indices = @transform_4, window_bounds = array<i64: 1, 32>}, {pipeline_mode = #tpu.pipeline_mode<synchronous>, transform_indices = @transform_5, window_bounds = array<i64: 2, 32, 128>}, {pipeline_mode = #tpu.pipeline_mode<synchronous>, transform_indices = @transform_6, window_bounds = array<i64: 2, 32, 128>}, {pipeline_mode = #tpu.pipeline_mode<synchronous>, transform_indices = @transform_7, window_bounds = array<i64: 2, 1, 128>}, {transform_indices = @transform_8, window_bounds = array<i64: 2, 256>}, {transform_indices = @transform_9, window_bounds = array<i64: 2, 128>}]} {
    %c0 = arith.constant 0 : index
    %c0_0 = arith.constant 0 : index
    %0 = vector.load %arg1[%c0, %c0_0] : memref<16x1xi32, #tpu.memory_space<vmem>>, vector<16x1xi32>
    %1 = tpu.iota {dimensions = array<i32: 1>} : vector<16x13xi32>
    %2 = vector.broadcast %0 : vector<16x1xi32> to vector<16x13xi32>
    %3 = arith.cmpi eq, %2, %1 : vector<16x13xi32>
    %4 = arith.extui %3 : vector<16x13xi1> to vector<16x13xi32>
    %5 = arith.sitofp %4 : vector<16x13xi32> to vector<16x13xf32>
    %c0_1 = arith.constant 0 : index
    %c0_2 = arith.constant 0 : index
    %6 = vector.load %arg3[%c0_1, %c0_2] : memref<13x32xf32, #tpu.memory_space<vmem>>, vector<13x32xf32>
    %cst = arith.constant dense<0.000000e+00> : vector<16x32xf32>
    %7 = tpu.matmul %5, %6, %cst {dimension_numbers = #tpu.dot_dimension_numbers<[1], [0], [0], [1], [0, 0, 1, 1], [], []>} : vector<16x13xf32>, vector<13x32xf32>, vector<16x32xf32> -> vector<16x32xf32>
    %c0_3 = arith.constant 0 : index
    %c0_4 = arith.constant 0 : index
    %8 = vector.load %arg2[%c0_3, %c0_4] : memref<16x1xf32, #tpu.memory_space<vmem>>, vector<16x1xf32>
    %c0_5 = arith.constant 0 : index
    %c0_6 = arith.constant 0 : index
    %9 = vector.load %arg4[%c0_5, %c0_6] : memref<1x32xf32, #tpu.memory_space<vmem>>, vector<1x32xf32>
    %10 = vector.broadcast %8 : vector<16x1xf32> to vector<16x32xf32>
    %11 = vector.broadcast %9 : vector<1x32xf32> to vector<16x32xf32>
    %12 = arith.mulf %10, %11 : vector<16x32xf32>
    %13 = arith.addf %7, %12 : vector<16x32xf32>
    %c0_7 = arith.constant 0 : index
    %c0_8 = arith.constant 0 : index
    %14 = vector.load %arg5[%c0_7, %c0_8] : memref<1x32xf32, #tpu.memory_space<vmem>>, vector<1x32xf32>
    %15 = vector.broadcast %14 : vector<1x32xf32> to vector<16x32xf32>
    %16 = arith.addf %13, %15 : vector<16x32xf32>
    %cst_9 = arith.constant 5.65685415 : f32
    %17 = vector.broadcast %cst_9 : f32 to vector<16x32xf32>
    %18 = arith.mulf %16, %17 : vector<16x32xf32>
    %c0_10 = arith.constant 0 : index
    %c0_11 = arith.constant 0 : index
    %c0_12 = arith.constant 0 : index
    %19 = vector.load %arg6[%c0_10, %c0_11, %c0_12] : memref<2x32x128xf32, #tpu.memory_space<vmem>>, vector<1x32x128xf32>
    %20 = vector.shape_cast %19 : vector<1x32x128xf32> to vector<32x128xf32>
    %c1 = arith.constant 1 : index
    %c0_13 = arith.constant 0 : index
    %c0_14 = arith.constant 0 : index
    %21 = vector.load %arg6[%c1, %c0_13, %c0_14] : memref<2x32x128xf32, #tpu.memory_space<vmem>>, vector<1x32x128xf32>
    %22 = vector.shape_cast %21 : vector<1x32x128xf32> to vector<32x128xf32>
    %c0_15 = arith.constant 0 : index
    %c0_16 = arith.constant 0 : index
    %c0_17 = arith.constant 0 : index
    %23 = vector.load %arg7[%c0_15, %c0_16, %c0_17] : memref<2x32x128xf32, #tpu.memory_space<vmem>>, vector<1x32x128xf32>
    %24 = vector.shape_cast %23 : vector<1x32x128xf32> to vector<32x128xf32>
    %c1_18 = arith.constant 1 : index
    %c0_19 = arith.constant 0 : index
    %c0_20 = arith.constant 0 : index
    %25 = vector.load %arg7[%c1_18, %c0_19, %c0_20] : memref<2x32x128xf32, #tpu.memory_space<vmem>>, vector<1x32x128xf32>
    %26 = vector.shape_cast %25 : vector<1x32x128xf32> to vector<32x128xf32>
    %c0_21 = arith.constant 0 : index
    %c0_22 = arith.constant 0 : index
    %c0_23 = arith.constant 0 : index
    %27 = vector.load %arg8[%c0_21, %c0_22, %c0_23] : memref<2x1x128xf32, #tpu.memory_space<vmem>>, vector<1x1x128xf32>
    %28 = vector.shape_cast %27 : vector<1x1x128xf32> to vector<1x128xf32>
    %c1_24 = arith.constant 1 : index
    %c0_25 = arith.constant 0 : index
    %c0_26 = arith.constant 0 : index
    %29 = vector.load %arg8[%c1_24, %c0_25, %c0_26] : memref<2x1x128xf32, #tpu.memory_space<vmem>>, vector<1x1x128xf32>
    %30 = vector.shape_cast %29 : vector<1x1x128xf32> to vector<1x128xf32>
    %cst_27 = arith.constant dense<0.000000e+00> : vector<16x128xf32>
    %31 = tpu.matmul %18, %20, %cst_27 {dimension_numbers = #tpu.dot_dimension_numbers<[1], [0], [0], [1], [0, 0, 1, 1], [], []>} : vector<16x32xf32>, vector<32x128xf32>, vector<16x128xf32> -> vector<16x128xf32>
    %32 = vector.broadcast %28 : vector<1x128xf32> to vector<16x128xf32>
    %33 = arith.addf %31, %32 : vector<16x128xf32>
    %34 = vector.shape_cast %33 : vector<16x128xf32> to vector<2x8x128xf32>
    %cst_28 = arith.constant 0.000000e+00 : f32
    %35 = vector.broadcast %cst_28 : f32 to vector<2x32xf32>
    %cst_29 = arith.constant 0.000000e+00 : f32
    %36 = vector.broadcast %cst_29 : f32 to vector<2x32xf32>
    %cst_30 = arith.constant 0.000000e+00 : f32
    %37 = vector.broadcast %cst_30 : f32 to vector<2x32xf32>
    %cst_31 = arith.constant 0.000000e+00 : f32
    %38 = vector.broadcast %cst_31 : f32 to vector<2x32xf32>
    %39 = vector.extract_strided_slice %34 {offsets = [0, 0, 0], sizes = [2, 1, 128], strides = [1, 1, 1]} : vector<2x8x128xf32> to vector<2x1x128xf32>
    %40 = vector.shape_cast %39 : vector<2x1x128xf32> to vector<2x128xf32>
    %cst_32 = arith.constant dense<0.000000e+00> : vector<2x128xf32>
    %41 = tpu.matmul %35, %24, %cst_32 {dimension_numbers = #tpu.dot_dimension_numbers<[1], [0], [0], [1], [0, 0, 1, 1], [], []>} : vector<2x32xf32>, vector<32x128xf32>, vector<2x128xf32> -> vector<2x128xf32>
    %42 = arith.addf %40, %41 : vector<2x128xf32>
    %43 = math.tanh %42 : vector<2x128xf32>
    %44 = vector.extract_strided_slice %43 {offsets = [0, 0], sizes = [2, 32], strides = [1, 1]} : vector<2x128xf32> to vector<2x32xf32>
    %cst_33 = arith.constant 5.000000e-01 : f32
    %45 = vector.broadcast %cst_33 : f32 to vector<2x32xf32>
    %46 = arith.mulf %45, %44 : vector<2x32xf32>
    %cst_34 = arith.constant 5.000000e-01 : f32
    %47 = vector.broadcast %cst_34 : f32 to vector<2x32xf32>
    %48 = arith.addf %46, %47 : vector<2x32xf32>
    %49 = vector.extract_strided_slice %43 {offsets = [0, 32], sizes = [2, 32], strides = [1, 1]} : vector<2x128xf32> to vector<2x32xf32>
    %cst_35 = arith.constant 5.000000e-01 : f32
    %50 = vector.broadcast %cst_35 : f32 to vector<2x32xf32>
    %51 = arith.mulf %50, %49 : vector<2x32xf32>
    %cst_36 = arith.constant 5.000000e-01 : f32
    %52 = vector.broadcast %cst_36 : f32 to vector<2x32xf32>
    %53 = arith.addf %51, %52 : vector<2x32xf32>
    %54 = vector.extract_strided_slice %43 {offsets = [0, 64], sizes = [2, 32], strides = [1, 1]} : vector<2x128xf32> to vector<2x32xf32>
    %55 = vector.extract_strided_slice %43 {offsets = [0, 96], sizes = [2, 32], strides = [1, 1]} : vector<2x128xf32> to vector<2x32xf32>
    %cst_37 = arith.constant 5.000000e-01 : f32
    %56 = vector.broadcast %cst_37 : f32 to vector<2x32xf32>
    %57 = arith.mulf %56, %55 : vector<2x32xf32>
    %cst_38 = arith.constant 5.000000e-01 : f32
    %58 = vector.broadcast %cst_38 : f32 to vector<2x32xf32>
    %59 = arith.addf %57, %58 : vector<2x32xf32>
    %60 = arith.mulf %53, %37 : vector<2x32xf32>
    %61 = arith.mulf %48, %54 : vector<2x32xf32>
    %62 = arith.addf %60, %61 : vector<2x32xf32>
    %63 = math.tanh %62 : vector<2x32xf32>
    %64 = arith.mulf %59, %63 : vector<2x32xf32>
    %cst_39 = arith.constant dense<0.000000e+00> : vector<2x128xf32>
    %65 = tpu.matmul %64, %22, %cst_39 {dimension_numbers = #tpu.dot_dimension_numbers<[1], [0], [0], [1], [0, 0, 1, 1], [], []>} : vector<2x32xf32>, vector<32x128xf32>, vector<2x128xf32> -> vector<2x128xf32>
    %cst_40 = arith.constant dense<0.000000e+00> : vector<2x128xf32>
    %66 = tpu.matmul %36, %26, %cst_40 {dimension_numbers = #tpu.dot_dimension_numbers<[1], [0], [0], [1], [0, 0, 1, 1], [], []>} : vector<2x32xf32>, vector<32x128xf32>, vector<2x128xf32> -> vector<2x128xf32>
    %67 = arith.addf %65, %66 : vector<2x128xf32>
    %68 = vector.broadcast %30 : vector<1x128xf32> to vector<2x128xf32>
    %69 = arith.addf %67, %68 : vector<2x128xf32>
    %70 = math.tanh %69 : vector<2x128xf32>
    %71 = vector.extract_strided_slice %70 {offsets = [0, 0], sizes = [2, 32], strides = [1, 1]} : vector<2x128xf32> to vector<2x32xf32>
    %cst_41 = arith.constant 5.000000e-01 : f32
    %72 = vector.broadcast %cst_41 : f32 to vector<2x32xf32>
    %73 = arith.mulf %72, %71 : vector<2x32xf32>
    %cst_42 = arith.constant 5.000000e-01 : f32
    %74 = vector.broadcast %cst_42 : f32 to vector<2x32xf32>
    %75 = arith.addf %73, %74 : vector<2x32xf32>
    %76 = vector.extract_strided_slice %70 {offsets = [0, 32], sizes = [2, 32], strides = [1, 1]} : vector<2x128xf32> to vector<2x32xf32>
    %cst_43 = arith.constant 5.000000e-01 : f32
    %77 = vector.broadcast %cst_43 : f32 to vector<2x32xf32>
    %78 = arith.mulf %77, %76 : vector<2x32xf32>
    %cst_44 = arith.constant 5.000000e-01 : f32
    %79 = vector.broadcast %cst_44 : f32 to vector<2x32xf32>
    %80 = arith.addf %78, %79 : vector<2x32xf32>
    %81 = vector.extract_strided_slice %70 {offsets = [0, 64], sizes = [2, 32], strides = [1, 1]} : vector<2x128xf32> to vector<2x32xf32>
    %82 = vector.extract_strided_slice %70 {offsets = [0, 96], sizes = [2, 32], strides = [1, 1]} : vector<2x128xf32> to vector<2x32xf32>
    %cst_45 = arith.constant 5.000000e-01 : f32
    %83 = vector.broadcast %cst_45 : f32 to vector<2x32xf32>
    %84 = arith.mulf %83, %82 : vector<2x32xf32>
    %cst_46 = arith.constant 5.000000e-01 : f32
    %85 = vector.broadcast %cst_46 : f32 to vector<2x32xf32>
    %86 = arith.addf %84, %85 : vector<2x32xf32>
    %87 = arith.mulf %80, %38 : vector<2x32xf32>
    %88 = arith.mulf %75, %81 : vector<2x32xf32>
    %89 = arith.addf %87, %88 : vector<2x32xf32>
    %90 = math.tanh %89 : vector<2x32xf32>
    %91 = arith.mulf %86, %90 : vector<2x32xf32>
    %92 = vector.extract_strided_slice %34 {offsets = [0, 1, 0], sizes = [2, 1, 128], strides = [1, 1, 1]} : vector<2x8x128xf32> to vector<2x1x128xf32>
    %93 = vector.shape_cast %92 : vector<2x1x128xf32> to vector<2x128xf32>
    %cst_47 = arith.constant dense<0.000000e+00> : vector<2x128xf32>
    %94 = tpu.matmul %64, %24, %cst_47 {dimension_numbers = #tpu.dot_dimension_numbers<[1], [0], [0], [1], [0, 0, 1, 1], [], []>} : vector<2x32xf32>, vector<32x128xf32>, vector<2x128xf32> -> vector<2x128xf32>
    %95 = arith.addf %93, %94 : vector<2x128xf32>
    %96 = math.tanh %95 : vector<2x128xf32>
    %97 = vector.extract_strided_slice %96 {offsets = [0, 0], sizes = [2, 32], strides = [1, 1]} : vector<2x128xf32> to vector<2x32xf32>
    %cst_48 = arith.constant 5.000000e-01 : f32
    %98 = vector.broadcast %cst_48 : f32 to vector<2x32xf32>
    %99 = arith.mulf %98, %97 : vector<2x32xf32>
    %cst_49 = arith.constant 5.000000e-01 : f32
    %100 = vector.broadcast %cst_49 : f32 to vector<2x32xf32>
    %101 = arith.addf %99, %100 : vector<2x32xf32>
    %102 = vector.extract_strided_slice %96 {offsets = [0, 32], sizes = [2, 32], strides = [1, 1]} : vector<2x128xf32> to vector<2x32xf32>
    %cst_50 = arith.constant 5.000000e-01 : f32
    %103 = vector.broadcast %cst_50 : f32 to vector<2x32xf32>
    %104 = arith.mulf %103, %102 : vector<2x32xf32>
    %cst_51 = arith.constant 5.000000e-01 : f32
    %105 = vector.broadcast %cst_51 : f32 to vector<2x32xf32>
    %106 = arith.addf %104, %105 : vector<2x32xf32>
    %107 = vector.extract_strided_slice %96 {offsets = [0, 64], sizes = [2, 32], strides = [1, 1]} : vector<2x128xf32> to vector<2x32xf32>
    %108 = vector.extract_strided_slice %96 {offsets = [0, 96], sizes = [2, 32], strides = [1, 1]} : vector<2x128xf32> to vector<2x32xf32>
    %cst_52 = arith.constant 5.000000e-01 : f32
    %109 = vector.broadcast %cst_52 : f32 to vector<2x32xf32>
    %110 = arith.mulf %109, %108 : vector<2x32xf32>
    %cst_53 = arith.constant 5.000000e-01 : f32
    %111 = vector.broadcast %cst_53 : f32 to vector<2x32xf32>
    %112 = arith.addf %110, %111 : vector<2x32xf32>
    %113 = arith.mulf %106, %62 : vector<2x32xf32>
    %114 = arith.mulf %101, %107 : vector<2x32xf32>
    %115 = arith.addf %113, %114 : vector<2x32xf32>
    %116 = math.tanh %115 : vector<2x32xf32>
    %117 = arith.mulf %112, %116 : vector<2x32xf32>
    %cst_54 = arith.constant dense<0.000000e+00> : vector<2x128xf32>
    %118 = tpu.matmul %117, %22, %cst_54 {dimension_numbers = #tpu.dot_dimension_numbers<[1], [0], [0], [1], [0, 0, 1, 1], [], []>} : vector<2x32xf32>, vector<32x128xf32>, vector<2x128xf32> -> vector<2x128xf32>
    %cst_55 = arith.constant dense<0.000000e+00> : vector<2x128xf32>
    %119 = tpu.matmul %91, %26, %cst_55 {dimension_numbers = #tpu.dot_dimension_numbers<[1], [0], [0], [1], [0, 0, 1, 1], [], []>} : vector<2x32xf32>, vector<32x128xf32>, vector<2x128xf32> -> vector<2x128xf32>
    %120 = arith.addf %118, %119 : vector<2x128xf32>
    %121 = vector.broadcast %30 : vector<1x128xf32> to vector<2x128xf32>
    %122 = arith.addf %120, %121 : vector<2x128xf32>
    %123 = math.tanh %122 : vector<2x128xf32>
    %124 = vector.extract_strided_slice %123 {offsets = [0, 0], sizes = [2, 32], strides = [1, 1]} : vector<2x128xf32> to vector<2x32xf32>
    %cst_56 = arith.constant 5.000000e-01 : f32
    %125 = vector.broadcast %cst_56 : f32 to vector<2x32xf32>
    %126 = arith.mulf %125, %124 : vector<2x32xf32>
    %cst_57 = arith.constant 5.000000e-01 : f32
    %127 = vector.broadcast %cst_57 : f32 to vector<2x32xf32>
    %128 = arith.addf %126, %127 : vector<2x32xf32>
    %129 = vector.extract_strided_slice %123 {offsets = [0, 32], sizes = [2, 32], strides = [1, 1]} : vector<2x128xf32> to vector<2x32xf32>
    %cst_58 = arith.constant 5.000000e-01 : f32
    %130 = vector.broadcast %cst_58 : f32 to vector<2x32xf32>
    %131 = arith.mulf %130, %129 : vector<2x32xf32>
    %cst_59 = arith.constant 5.000000e-01 : f32
    %132 = vector.broadcast %cst_59 : f32 to vector<2x32xf32>
    %133 = arith.addf %131, %132 : vector<2x32xf32>
    %134 = vector.extract_strided_slice %123 {offsets = [0, 64], sizes = [2, 32], strides = [1, 1]} : vector<2x128xf32> to vector<2x32xf32>
    %135 = vector.extract_strided_slice %123 {offsets = [0, 96], sizes = [2, 32], strides = [1, 1]} : vector<2x128xf32> to vector<2x32xf32>
    %cst_60 = arith.constant 5.000000e-01 : f32
    %136 = vector.broadcast %cst_60 : f32 to vector<2x32xf32>
    %137 = arith.mulf %136, %135 : vector<2x32xf32>
    %cst_61 = arith.constant 5.000000e-01 : f32
    %138 = vector.broadcast %cst_61 : f32 to vector<2x32xf32>
    %139 = arith.addf %137, %138 : vector<2x32xf32>
    %140 = arith.mulf %133, %89 : vector<2x32xf32>
    %141 = arith.mulf %128, %134 : vector<2x32xf32>
    %142 = arith.addf %140, %141 : vector<2x32xf32>
    %143 = math.tanh %142 : vector<2x32xf32>
    %144 = arith.mulf %139, %143 : vector<2x32xf32>
    %145 = vector.extract_strided_slice %34 {offsets = [0, 2, 0], sizes = [2, 1, 128], strides = [1, 1, 1]} : vector<2x8x128xf32> to vector<2x1x128xf32>
    %146 = vector.shape_cast %145 : vector<2x1x128xf32> to vector<2x128xf32>
    %cst_62 = arith.constant dense<0.000000e+00> : vector<2x128xf32>
    %147 = tpu.matmul %117, %24, %cst_62 {dimension_numbers = #tpu.dot_dimension_numbers<[1], [0], [0], [1], [0, 0, 1, 1], [], []>} : vector<2x32xf32>, vector<32x128xf32>, vector<2x128xf32> -> vector<2x128xf32>
    %148 = arith.addf %146, %147 : vector<2x128xf32>
    %149 = math.tanh %148 : vector<2x128xf32>
    %150 = vector.extract_strided_slice %149 {offsets = [0, 0], sizes = [2, 32], strides = [1, 1]} : vector<2x128xf32> to vector<2x32xf32>
    %cst_63 = arith.constant 5.000000e-01 : f32
    %151 = vector.broadcast %cst_63 : f32 to vector<2x32xf32>
    %152 = arith.mulf %151, %150 : vector<2x32xf32>
    %cst_64 = arith.constant 5.000000e-01 : f32
    %153 = vector.broadcast %cst_64 : f32 to vector<2x32xf32>
    %154 = arith.addf %152, %153 : vector<2x32xf32>
    %155 = vector.extract_strided_slice %149 {offsets = [0, 32], sizes = [2, 32], strides = [1, 1]} : vector<2x128xf32> to vector<2x32xf32>
    %cst_65 = arith.constant 5.000000e-01 : f32
    %156 = vector.broadcast %cst_65 : f32 to vector<2x32xf32>
    %157 = arith.mulf %156, %155 : vector<2x32xf32>
    %cst_66 = arith.constant 5.000000e-01 : f32
    %158 = vector.broadcast %cst_66 : f32 to vector<2x32xf32>
    %159 = arith.addf %157, %158 : vector<2x32xf32>
    %160 = vector.extract_strided_slice %149 {offsets = [0, 64], sizes = [2, 32], strides = [1, 1]} : vector<2x128xf32> to vector<2x32xf32>
    %161 = vector.extract_strided_slice %149 {offsets = [0, 96], sizes = [2, 32], strides = [1, 1]} : vector<2x128xf32> to vector<2x32xf32>
    %cst_67 = arith.constant 5.000000e-01 : f32
    %162 = vector.broadcast %cst_67 : f32 to vector<2x32xf32>
    %163 = arith.mulf %162, %161 : vector<2x32xf32>
    %cst_68 = arith.constant 5.000000e-01 : f32
    %164 = vector.broadcast %cst_68 : f32 to vector<2x32xf32>
    %165 = arith.addf %163, %164 : vector<2x32xf32>
    %166 = arith.mulf %159, %115 : vector<2x32xf32>
    %167 = arith.mulf %154, %160 : vector<2x32xf32>
    %168 = arith.addf %166, %167 : vector<2x32xf32>
    %169 = math.tanh %168 : vector<2x32xf32>
    %170 = arith.mulf %165, %169 : vector<2x32xf32>
    %cst_69 = arith.constant dense<0.000000e+00> : vector<2x128xf32>
    %171 = tpu.matmul %170, %22, %cst_69 {dimension_numbers = #tpu.dot_dimension_numbers<[1], [0], [0], [1], [0, 0, 1, 1], [], []>} : vector<2x32xf32>, vector<32x128xf32>, vector<2x128xf32> -> vector<2x128xf32>
    %cst_70 = arith.constant dense<0.000000e+00> : vector<2x128xf32>
    %172 = tpu.matmul %144, %26, %cst_70 {dimension_numbers = #tpu.dot_dimension_numbers<[1], [0], [0], [1], [0, 0, 1, 1], [], []>} : vector<2x32xf32>, vector<32x128xf32>, vector<2x128xf32> -> vector<2x128xf32>
    %173 = arith.addf %171, %172 : vector<2x128xf32>
    %174 = vector.broadcast %30 : vector<1x128xf32> to vector<2x128xf32>
    %175 = arith.addf %173, %174 : vector<2x128xf32>
    %176 = math.tanh %175 : vector<2x128xf32>
    %177 = vector.extract_strided_slice %176 {offsets = [0, 0], sizes = [2, 32], strides = [1, 1]} : vector<2x128xf32> to vector<2x32xf32>
    %cst_71 = arith.constant 5.000000e-01 : f32
    %178 = vector.broadcast %cst_71 : f32 to vector<2x32xf32>
    %179 = arith.mulf %178, %177 : vector<2x32xf32>
    %cst_72 = arith.constant 5.000000e-01 : f32
    %180 = vector.broadcast %cst_72 : f32 to vector<2x32xf32>
    %181 = arith.addf %179, %180 : vector<2x32xf32>
    %182 = vector.extract_strided_slice %176 {offsets = [0, 32], sizes = [2, 32], strides = [1, 1]} : vector<2x128xf32> to vector<2x32xf32>
    %cst_73 = arith.constant 5.000000e-01 : f32
    %183 = vector.broadcast %cst_73 : f32 to vector<2x32xf32>
    %184 = arith.mulf %183, %182 : vector<2x32xf32>
    %cst_74 = arith.constant 5.000000e-01 : f32
    %185 = vector.broadcast %cst_74 : f32 to vector<2x32xf32>
    %186 = arith.addf %184, %185 : vector<2x32xf32>
    %187 = vector.extract_strided_slice %176 {offsets = [0, 64], sizes = [2, 32], strides = [1, 1]} : vector<2x128xf32> to vector<2x32xf32>
    %188 = vector.extract_strided_slice %176 {offsets = [0, 96], sizes = [2, 32], strides = [1, 1]} : vector<2x128xf32> to vector<2x32xf32>
    %cst_75 = arith.constant 5.000000e-01 : f32
    %189 = vector.broadcast %cst_75 : f32 to vector<2x32xf32>
    %190 = arith.mulf %189, %188 : vector<2x32xf32>
    %cst_76 = arith.constant 5.000000e-01 : f32
    %191 = vector.broadcast %cst_76 : f32 to vector<2x32xf32>
    %192 = arith.addf %190, %191 : vector<2x32xf32>
    %193 = arith.mulf %186, %142 : vector<2x32xf32>
    %194 = arith.mulf %181, %187 : vector<2x32xf32>
    %195 = arith.addf %193, %194 : vector<2x32xf32>
    %196 = math.tanh %195 : vector<2x32xf32>
    %197 = arith.mulf %192, %196 : vector<2x32xf32>
    %198 = vector.extract_strided_slice %34 {offsets = [0, 3, 0], sizes = [2, 1, 128], strides = [1, 1, 1]} : vector<2x8x128xf32> to vector<2x1x128xf32>
    %199 = vector.shape_cast %198 : vector<2x1x128xf32> to vector<2x128xf32>
    %cst_77 = arith.constant dense<0.000000e+00> : vector<2x128xf32>
    %200 = tpu.matmul %170, %24, %cst_77 {dimension_numbers = #tpu.dot_dimension_numbers<[1], [0], [0], [1], [0, 0, 1, 1], [], []>} : vector<2x32xf32>, vector<32x128xf32>, vector<2x128xf32> -> vector<2x128xf32>
    %201 = arith.addf %199, %200 : vector<2x128xf32>
    %202 = math.tanh %201 : vector<2x128xf32>
    %203 = vector.extract_strided_slice %202 {offsets = [0, 0], sizes = [2, 32], strides = [1, 1]} : vector<2x128xf32> to vector<2x32xf32>
    %cst_78 = arith.constant 5.000000e-01 : f32
    %204 = vector.broadcast %cst_78 : f32 to vector<2x32xf32>
    %205 = arith.mulf %204, %203 : vector<2x32xf32>
    %cst_79 = arith.constant 5.000000e-01 : f32
    %206 = vector.broadcast %cst_79 : f32 to vector<2x32xf32>
    %207 = arith.addf %205, %206 : vector<2x32xf32>
    %208 = vector.extract_strided_slice %202 {offsets = [0, 32], sizes = [2, 32], strides = [1, 1]} : vector<2x128xf32> to vector<2x32xf32>
    %cst_80 = arith.constant 5.000000e-01 : f32
    %209 = vector.broadcast %cst_80 : f32 to vector<2x32xf32>
    %210 = arith.mulf %209, %208 : vector<2x32xf32>
    %cst_81 = arith.constant 5.000000e-01 : f32
    %211 = vector.broadcast %cst_81 : f32 to vector<2x32xf32>
    %212 = arith.addf %210, %211 : vector<2x32xf32>
    %213 = vector.extract_strided_slice %202 {offsets = [0, 64], sizes = [2, 32], strides = [1, 1]} : vector<2x128xf32> to vector<2x32xf32>
    %214 = vector.extract_strided_slice %202 {offsets = [0, 96], sizes = [2, 32], strides = [1, 1]} : vector<2x128xf32> to vector<2x32xf32>
    %cst_82 = arith.constant 5.000000e-01 : f32
    %215 = vector.broadcast %cst_82 : f32 to vector<2x32xf32>
    %216 = arith.mulf %215, %214 : vector<2x32xf32>
    %cst_83 = arith.constant 5.000000e-01 : f32
    %217 = vector.broadcast %cst_83 : f32 to vector<2x32xf32>
    %218 = arith.addf %216, %217 : vector<2x32xf32>
    %219 = arith.mulf %212, %168 : vector<2x32xf32>
    %220 = arith.mulf %207, %213 : vector<2x32xf32>
    %221 = arith.addf %219, %220 : vector<2x32xf32>
    %222 = math.tanh %221 : vector<2x32xf32>
    %223 = arith.mulf %218, %222 : vector<2x32xf32>
    %cst_84 = arith.constant dense<0.000000e+00> : vector<2x128xf32>
    %224 = tpu.matmul %223, %22, %cst_84 {dimension_numbers = #tpu.dot_dimension_numbers<[1], [0], [0], [1], [0, 0, 1, 1], [], []>} : vector<2x32xf32>, vector<32x128xf32>, vector<2x128xf32> -> vector<2x128xf32>
    %cst_85 = arith.constant dense<0.000000e+00> : vector<2x128xf32>
    %225 = tpu.matmul %197, %26, %cst_85 {dimension_numbers = #tpu.dot_dimension_numbers<[1], [0], [0], [1], [0, 0, 1, 1], [], []>} : vector<2x32xf32>, vector<32x128xf32>, vector<2x128xf32> -> vector<2x128xf32>
    %226 = arith.addf %224, %225 : vector<2x128xf32>
    %227 = vector.broadcast %30 : vector<1x128xf32> to vector<2x128xf32>
    %228 = arith.addf %226, %227 : vector<2x128xf32>
    %229 = math.tanh %228 : vector<2x128xf32>
    %230 = vector.extract_strided_slice %229 {offsets = [0, 0], sizes = [2, 32], strides = [1, 1]} : vector<2x128xf32> to vector<2x32xf32>
    %cst_86 = arith.constant 5.000000e-01 : f32
    %231 = vector.broadcast %cst_86 : f32 to vector<2x32xf32>
    %232 = arith.mulf %231, %230 : vector<2x32xf32>
    %cst_87 = arith.constant 5.000000e-01 : f32
    %233 = vector.broadcast %cst_87 : f32 to vector<2x32xf32>
    %234 = arith.addf %232, %233 : vector<2x32xf32>
    %235 = vector.extract_strided_slice %229 {offsets = [0, 32], sizes = [2, 32], strides = [1, 1]} : vector<2x128xf32> to vector<2x32xf32>
    %cst_88 = arith.constant 5.000000e-01 : f32
    %236 = vector.broadcast %cst_88 : f32 to vector<2x32xf32>
    %237 = arith.mulf %236, %235 : vector<2x32xf32>
    %cst_89 = arith.constant 5.000000e-01 : f32
    %238 = vector.broadcast %cst_89 : f32 to vector<2x32xf32>
    %239 = arith.addf %237, %238 : vector<2x32xf32>
    %240 = vector.extract_strided_slice %229 {offsets = [0, 64], sizes = [2, 32], strides = [1, 1]} : vector<2x128xf32> to vector<2x32xf32>
    %241 = vector.extract_strided_slice %229 {offsets = [0, 96], sizes = [2, 32], strides = [1, 1]} : vector<2x128xf32> to vector<2x32xf32>
    %cst_90 = arith.constant 5.000000e-01 : f32
    %242 = vector.broadcast %cst_90 : f32 to vector<2x32xf32>
    %243 = arith.mulf %242, %241 : vector<2x32xf32>
    %cst_91 = arith.constant 5.000000e-01 : f32
    %244 = vector.broadcast %cst_91 : f32 to vector<2x32xf32>
    %245 = arith.addf %243, %244 : vector<2x32xf32>
    %246 = arith.mulf %239, %195 : vector<2x32xf32>
    %247 = arith.mulf %234, %240 : vector<2x32xf32>
    %248 = arith.addf %246, %247 : vector<2x32xf32>
    %249 = math.tanh %248 : vector<2x32xf32>
    %250 = arith.mulf %245, %249 : vector<2x32xf32>
    %251 = vector.extract_strided_slice %34 {offsets = [0, 4, 0], sizes = [2, 1, 128], strides = [1, 1, 1]} : vector<2x8x128xf32> to vector<2x1x128xf32>
    %252 = vector.shape_cast %251 : vector<2x1x128xf32> to vector<2x128xf32>
    %cst_92 = arith.constant dense<0.000000e+00> : vector<2x128xf32>
    %253 = tpu.matmul %223, %24, %cst_92 {dimension_numbers = #tpu.dot_dimension_numbers<[1], [0], [0], [1], [0, 0, 1, 1], [], []>} : vector<2x32xf32>, vector<32x128xf32>, vector<2x128xf32> -> vector<2x128xf32>
    %254 = arith.addf %252, %253 : vector<2x128xf32>
    %255 = math.tanh %254 : vector<2x128xf32>
    %256 = vector.extract_strided_slice %255 {offsets = [0, 0], sizes = [2, 32], strides = [1, 1]} : vector<2x128xf32> to vector<2x32xf32>
    %cst_93 = arith.constant 5.000000e-01 : f32
    %257 = vector.broadcast %cst_93 : f32 to vector<2x32xf32>
    %258 = arith.mulf %257, %256 : vector<2x32xf32>
    %cst_94 = arith.constant 5.000000e-01 : f32
    %259 = vector.broadcast %cst_94 : f32 to vector<2x32xf32>
    %260 = arith.addf %258, %259 : vector<2x32xf32>
    %261 = vector.extract_strided_slice %255 {offsets = [0, 32], sizes = [2, 32], strides = [1, 1]} : vector<2x128xf32> to vector<2x32xf32>
    %cst_95 = arith.constant 5.000000e-01 : f32
    %262 = vector.broadcast %cst_95 : f32 to vector<2x32xf32>
    %263 = arith.mulf %262, %261 : vector<2x32xf32>
    %cst_96 = arith.constant 5.000000e-01 : f32
    %264 = vector.broadcast %cst_96 : f32 to vector<2x32xf32>
    %265 = arith.addf %263, %264 : vector<2x32xf32>
    %266 = vector.extract_strided_slice %255 {offsets = [0, 64], sizes = [2, 32], strides = [1, 1]} : vector<2x128xf32> to vector<2x32xf32>
    %267 = vector.extract_strided_slice %255 {offsets = [0, 96], sizes = [2, 32], strides = [1, 1]} : vector<2x128xf32> to vector<2x32xf32>
    %cst_97 = arith.constant 5.000000e-01 : f32
    %268 = vector.broadcast %cst_97 : f32 to vector<2x32xf32>
    %269 = arith.mulf %268, %267 : vector<2x32xf32>
    %cst_98 = arith.constant 5.000000e-01 : f32
    %270 = vector.broadcast %cst_98 : f32 to vector<2x32xf32>
    %271 = arith.addf %269, %270 : vector<2x32xf32>
    %272 = arith.mulf %265, %221 : vector<2x32xf32>
    %273 = arith.mulf %260, %266 : vector<2x32xf32>
    %274 = arith.addf %272, %273 : vector<2x32xf32>
    %275 = math.tanh %274 : vector<2x32xf32>
    %276 = arith.mulf %271, %275 : vector<2x32xf32>
    %cst_99 = arith.constant dense<0.000000e+00> : vector<2x128xf32>
    %277 = tpu.matmul %276, %22, %cst_99 {dimension_numbers = #tpu.dot_dimension_numbers<[1], [0], [0], [1], [0, 0, 1, 1], [], []>} : vector<2x32xf32>, vector<32x128xf32>, vector<2x128xf32> -> vector<2x128xf32>
    %cst_100 = arith.constant dense<0.000000e+00> : vector<2x128xf32>
    %278 = tpu.matmul %250, %26, %cst_100 {dimension_numbers = #tpu.dot_dimension_numbers<[1], [0], [0], [1], [0, 0, 1, 1], [], []>} : vector<2x32xf32>, vector<32x128xf32>, vector<2x128xf32> -> vector<2x128xf32>
    %279 = arith.addf %277, %278 : vector<2x128xf32>
    %280 = vector.broadcast %30 : vector<1x128xf32> to vector<2x128xf32>
    %281 = arith.addf %279, %280 : vector<2x128xf32>
    %282 = math.tanh %281 : vector<2x128xf32>
    %283 = vector.extract_strided_slice %282 {offsets = [0, 0], sizes = [2, 32], strides = [1, 1]} : vector<2x128xf32> to vector<2x32xf32>
    %cst_101 = arith.constant 5.000000e-01 : f32
    %284 = vector.broadcast %cst_101 : f32 to vector<2x32xf32>
    %285 = arith.mulf %284, %283 : vector<2x32xf32>
    %cst_102 = arith.constant 5.000000e-01 : f32
    %286 = vector.broadcast %cst_102 : f32 to vector<2x32xf32>
    %287 = arith.addf %285, %286 : vector<2x32xf32>
    %288 = vector.extract_strided_slice %282 {offsets = [0, 32], sizes = [2, 32], strides = [1, 1]} : vector<2x128xf32> to vector<2x32xf32>
    %cst_103 = arith.constant 5.000000e-01 : f32
    %289 = vector.broadcast %cst_103 : f32 to vector<2x32xf32>
    %290 = arith.mulf %289, %288 : vector<2x32xf32>
    %cst_104 = arith.constant 5.000000e-01 : f32
    %291 = vector.broadcast %cst_104 : f32 to vector<2x32xf32>
    %292 = arith.addf %290, %291 : vector<2x32xf32>
    %293 = vector.extract_strided_slice %282 {offsets = [0, 64], sizes = [2, 32], strides = [1, 1]} : vector<2x128xf32> to vector<2x32xf32>
    %294 = vector.extract_strided_slice %282 {offsets = [0, 96], sizes = [2, 32], strides = [1, 1]} : vector<2x128xf32> to vector<2x32xf32>
    %cst_105 = arith.constant 5.000000e-01 : f32
    %295 = vector.broadcast %cst_105 : f32 to vector<2x32xf32>
    %296 = arith.mulf %295, %294 : vector<2x32xf32>
    %cst_106 = arith.constant 5.000000e-01 : f32
    %297 = vector.broadcast %cst_106 : f32 to vector<2x32xf32>
    %298 = arith.addf %296, %297 : vector<2x32xf32>
    %299 = arith.mulf %292, %248 : vector<2x32xf32>
    %300 = arith.mulf %287, %293 : vector<2x32xf32>
    %301 = arith.addf %299, %300 : vector<2x32xf32>
    %302 = math.tanh %301 : vector<2x32xf32>
    %303 = arith.mulf %298, %302 : vector<2x32xf32>
    %304 = vector.extract_strided_slice %34 {offsets = [0, 5, 0], sizes = [2, 1, 128], strides = [1, 1, 1]} : vector<2x8x128xf32> to vector<2x1x128xf32>
    %305 = vector.shape_cast %304 : vector<2x1x128xf32> to vector<2x128xf32>
    %cst_107 = arith.constant dense<0.000000e+00> : vector<2x128xf32>
    %306 = tpu.matmul %276, %24, %cst_107 {dimension_numbers = #tpu.dot_dimension_numbers<[1], [0], [0], [1], [0, 0, 1, 1], [], []>} : vector<2x32xf32>, vector<32x128xf32>, vector<2x128xf32> -> vector<2x128xf32>
    %307 = arith.addf %305, %306 : vector<2x128xf32>
    %308 = math.tanh %307 : vector<2x128xf32>
    %309 = vector.extract_strided_slice %308 {offsets = [0, 0], sizes = [2, 32], strides = [1, 1]} : vector<2x128xf32> to vector<2x32xf32>
    %cst_108 = arith.constant 5.000000e-01 : f32
    %310 = vector.broadcast %cst_108 : f32 to vector<2x32xf32>
    %311 = arith.mulf %310, %309 : vector<2x32xf32>
    %cst_109 = arith.constant 5.000000e-01 : f32
    %312 = vector.broadcast %cst_109 : f32 to vector<2x32xf32>
    %313 = arith.addf %311, %312 : vector<2x32xf32>
    %314 = vector.extract_strided_slice %308 {offsets = [0, 32], sizes = [2, 32], strides = [1, 1]} : vector<2x128xf32> to vector<2x32xf32>
    %cst_110 = arith.constant 5.000000e-01 : f32
    %315 = vector.broadcast %cst_110 : f32 to vector<2x32xf32>
    %316 = arith.mulf %315, %314 : vector<2x32xf32>
    %cst_111 = arith.constant 5.000000e-01 : f32
    %317 = vector.broadcast %cst_111 : f32 to vector<2x32xf32>
    %318 = arith.addf %316, %317 : vector<2x32xf32>
    %319 = vector.extract_strided_slice %308 {offsets = [0, 64], sizes = [2, 32], strides = [1, 1]} : vector<2x128xf32> to vector<2x32xf32>
    %320 = vector.extract_strided_slice %308 {offsets = [0, 96], sizes = [2, 32], strides = [1, 1]} : vector<2x128xf32> to vector<2x32xf32>
    %cst_112 = arith.constant 5.000000e-01 : f32
    %321 = vector.broadcast %cst_112 : f32 to vector<2x32xf32>
    %322 = arith.mulf %321, %320 : vector<2x32xf32>
    %cst_113 = arith.constant 5.000000e-01 : f32
    %323 = vector.broadcast %cst_113 : f32 to vector<2x32xf32>
    %324 = arith.addf %322, %323 : vector<2x32xf32>
    %325 = arith.mulf %318, %274 : vector<2x32xf32>
    %326 = arith.mulf %313, %319 : vector<2x32xf32>
    %327 = arith.addf %325, %326 : vector<2x32xf32>
    %328 = math.tanh %327 : vector<2x32xf32>
    %329 = arith.mulf %324, %328 : vector<2x32xf32>
    %cst_114 = arith.constant dense<0.000000e+00> : vector<2x128xf32>
    %330 = tpu.matmul %329, %22, %cst_114 {dimension_numbers = #tpu.dot_dimension_numbers<[1], [0], [0], [1], [0, 0, 1, 1], [], []>} : vector<2x32xf32>, vector<32x128xf32>, vector<2x128xf32> -> vector<2x128xf32>
    %cst_115 = arith.constant dense<0.000000e+00> : vector<2x128xf32>
    %331 = tpu.matmul %303, %26, %cst_115 {dimension_numbers = #tpu.dot_dimension_numbers<[1], [0], [0], [1], [0, 0, 1, 1], [], []>} : vector<2x32xf32>, vector<32x128xf32>, vector<2x128xf32> -> vector<2x128xf32>
    %332 = arith.addf %330, %331 : vector<2x128xf32>
    %333 = vector.broadcast %30 : vector<1x128xf32> to vector<2x128xf32>
    %334 = arith.addf %332, %333 : vector<2x128xf32>
    %335 = math.tanh %334 : vector<2x128xf32>
    %336 = vector.extract_strided_slice %335 {offsets = [0, 0], sizes = [2, 32], strides = [1, 1]} : vector<2x128xf32> to vector<2x32xf32>
    %cst_116 = arith.constant 5.000000e-01 : f32
    %337 = vector.broadcast %cst_116 : f32 to vector<2x32xf32>
    %338 = arith.mulf %337, %336 : vector<2x32xf32>
    %cst_117 = arith.constant 5.000000e-01 : f32
    %339 = vector.broadcast %cst_117 : f32 to vector<2x32xf32>
    %340 = arith.addf %338, %339 : vector<2x32xf32>
    %341 = vector.extract_strided_slice %335 {offsets = [0, 32], sizes = [2, 32], strides = [1, 1]} : vector<2x128xf32> to vector<2x32xf32>
    %cst_118 = arith.constant 5.000000e-01 : f32
    %342 = vector.broadcast %cst_118 : f32 to vector<2x32xf32>
    %343 = arith.mulf %342, %341 : vector<2x32xf32>
    %cst_119 = arith.constant 5.000000e-01 : f32
    %344 = vector.broadcast %cst_119 : f32 to vector<2x32xf32>
    %345 = arith.addf %343, %344 : vector<2x32xf32>
    %346 = vector.extract_strided_slice %335 {offsets = [0, 64], sizes = [2, 32], strides = [1, 1]} : vector<2x128xf32> to vector<2x32xf32>
    %347 = vector.extract_strided_slice %335 {offsets = [0, 96], sizes = [2, 32], strides = [1, 1]} : vector<2x128xf32> to vector<2x32xf32>
    %cst_120 = arith.constant 5.000000e-01 : f32
    %348 = vector.broadcast %cst_120 : f32 to vector<2x32xf32>
    %349 = arith.mulf %348, %347 : vector<2x32xf32>
    %cst_121 = arith.constant 5.000000e-01 : f32
    %350 = vector.broadcast %cst_121 : f32 to vector<2x32xf32>
    %351 = arith.addf %349, %350 : vector<2x32xf32>
    %352 = arith.mulf %345, %301 : vector<2x32xf32>
    %353 = arith.mulf %340, %346 : vector<2x32xf32>
    %354 = arith.addf %352, %353 : vector<2x32xf32>
    %355 = math.tanh %354 : vector<2x32xf32>
    %356 = arith.mulf %351, %355 : vector<2x32xf32>
    %357 = vector.extract_strided_slice %34 {offsets = [0, 6, 0], sizes = [2, 1, 128], strides = [1, 1, 1]} : vector<2x8x128xf32> to vector<2x1x128xf32>
    %358 = vector.shape_cast %357 : vector<2x1x128xf32> to vector<2x128xf32>
    %cst_122 = arith.constant dense<0.000000e+00> : vector<2x128xf32>
    %359 = tpu.matmul %329, %24, %cst_122 {dimension_numbers = #tpu.dot_dimension_numbers<[1], [0], [0], [1], [0, 0, 1, 1], [], []>} : vector<2x32xf32>, vector<32x128xf32>, vector<2x128xf32> -> vector<2x128xf32>
    %360 = arith.addf %358, %359 : vector<2x128xf32>
    %361 = math.tanh %360 : vector<2x128xf32>
    %362 = vector.extract_strided_slice %361 {offsets = [0, 0], sizes = [2, 32], strides = [1, 1]} : vector<2x128xf32> to vector<2x32xf32>
    %cst_123 = arith.constant 5.000000e-01 : f32
    %363 = vector.broadcast %cst_123 : f32 to vector<2x32xf32>
    %364 = arith.mulf %363, %362 : vector<2x32xf32>
    %cst_124 = arith.constant 5.000000e-01 : f32
    %365 = vector.broadcast %cst_124 : f32 to vector<2x32xf32>
    %366 = arith.addf %364, %365 : vector<2x32xf32>
    %367 = vector.extract_strided_slice %361 {offsets = [0, 32], sizes = [2, 32], strides = [1, 1]} : vector<2x128xf32> to vector<2x32xf32>
    %cst_125 = arith.constant 5.000000e-01 : f32
    %368 = vector.broadcast %cst_125 : f32 to vector<2x32xf32>
    %369 = arith.mulf %368, %367 : vector<2x32xf32>
    %cst_126 = arith.constant 5.000000e-01 : f32
    %370 = vector.broadcast %cst_126 : f32 to vector<2x32xf32>
    %371 = arith.addf %369, %370 : vector<2x32xf32>
    %372 = vector.extract_strided_slice %361 {offsets = [0, 64], sizes = [2, 32], strides = [1, 1]} : vector<2x128xf32> to vector<2x32xf32>
    %373 = vector.extract_strided_slice %361 {offsets = [0, 96], sizes = [2, 32], strides = [1, 1]} : vector<2x128xf32> to vector<2x32xf32>
    %cst_127 = arith.constant 5.000000e-01 : f32
    %374 = vector.broadcast %cst_127 : f32 to vector<2x32xf32>
    %375 = arith.mulf %374, %373 : vector<2x32xf32>
    %cst_128 = arith.constant 5.000000e-01 : f32
    %376 = vector.broadcast %cst_128 : f32 to vector<2x32xf32>
    %377 = arith.addf %375, %376 : vector<2x32xf32>
    %378 = arith.mulf %371, %327 : vector<2x32xf32>
    %379 = arith.mulf %366, %372 : vector<2x32xf32>
    %380 = arith.addf %378, %379 : vector<2x32xf32>
    %381 = math.tanh %380 : vector<2x32xf32>
    %382 = arith.mulf %377, %381 : vector<2x32xf32>
    %cst_129 = arith.constant dense<0.000000e+00> : vector<2x128xf32>
    %383 = tpu.matmul %382, %22, %cst_129 {dimension_numbers = #tpu.dot_dimension_numbers<[1], [0], [0], [1], [0, 0, 1, 1], [], []>} : vector<2x32xf32>, vector<32x128xf32>, vector<2x128xf32> -> vector<2x128xf32>
    %cst_130 = arith.constant dense<0.000000e+00> : vector<2x128xf32>
    %384 = tpu.matmul %356, %26, %cst_130 {dimension_numbers = #tpu.dot_dimension_numbers<[1], [0], [0], [1], [0, 0, 1, 1], [], []>} : vector<2x32xf32>, vector<32x128xf32>, vector<2x128xf32> -> vector<2x128xf32>
    %385 = arith.addf %383, %384 : vector<2x128xf32>
    %386 = vector.broadcast %30 : vector<1x128xf32> to vector<2x128xf32>
    %387 = arith.addf %385, %386 : vector<2x128xf32>
    %388 = math.tanh %387 : vector<2x128xf32>
    %389 = vector.extract_strided_slice %388 {offsets = [0, 0], sizes = [2, 32], strides = [1, 1]} : vector<2x128xf32> to vector<2x32xf32>
    %cst_131 = arith.constant 5.000000e-01 : f32
    %390 = vector.broadcast %cst_131 : f32 to vector<2x32xf32>
    %391 = arith.mulf %390, %389 : vector<2x32xf32>
    %cst_132 = arith.constant 5.000000e-01 : f32
    %392 = vector.broadcast %cst_132 : f32 to vector<2x32xf32>
    %393 = arith.addf %391, %392 : vector<2x32xf32>
    %394 = vector.extract_strided_slice %388 {offsets = [0, 32], sizes = [2, 32], strides = [1, 1]} : vector<2x128xf32> to vector<2x32xf32>
    %cst_133 = arith.constant 5.000000e-01 : f32
    %395 = vector.broadcast %cst_133 : f32 to vector<2x32xf32>
    %396 = arith.mulf %395, %394 : vector<2x32xf32>
    %cst_134 = arith.constant 5.000000e-01 : f32
    %397 = vector.broadcast %cst_134 : f32 to vector<2x32xf32>
    %398 = arith.addf %396, %397 : vector<2x32xf32>
    %399 = vector.extract_strided_slice %388 {offsets = [0, 64], sizes = [2, 32], strides = [1, 1]} : vector<2x128xf32> to vector<2x32xf32>
    %400 = vector.extract_strided_slice %388 {offsets = [0, 96], sizes = [2, 32], strides = [1, 1]} : vector<2x128xf32> to vector<2x32xf32>
    %cst_135 = arith.constant 5.000000e-01 : f32
    %401 = vector.broadcast %cst_135 : f32 to vector<2x32xf32>
    %402 = arith.mulf %401, %400 : vector<2x32xf32>
    %cst_136 = arith.constant 5.000000e-01 : f32
    %403 = vector.broadcast %cst_136 : f32 to vector<2x32xf32>
    %404 = arith.addf %402, %403 : vector<2x32xf32>
    %405 = arith.mulf %398, %354 : vector<2x32xf32>
    %406 = arith.mulf %393, %399 : vector<2x32xf32>
    %407 = arith.addf %405, %406 : vector<2x32xf32>
    %408 = math.tanh %407 : vector<2x32xf32>
    %409 = arith.mulf %404, %408 : vector<2x32xf32>
    %410 = vector.extract_strided_slice %34 {offsets = [0, 7, 0], sizes = [2, 1, 128], strides = [1, 1, 1]} : vector<2x8x128xf32> to vector<2x1x128xf32>
    %411 = vector.shape_cast %410 : vector<2x1x128xf32> to vector<2x128xf32>
    %cst_137 = arith.constant dense<0.000000e+00> : vector<2x128xf32>
    %412 = tpu.matmul %382, %24, %cst_137 {dimension_numbers = #tpu.dot_dimension_numbers<[1], [0], [0], [1], [0, 0, 1, 1], [], []>} : vector<2x32xf32>, vector<32x128xf32>, vector<2x128xf32> -> vector<2x128xf32>
    %413 = arith.addf %411, %412 : vector<2x128xf32>
    %414 = math.tanh %413 : vector<2x128xf32>
    %415 = vector.extract_strided_slice %414 {offsets = [0, 0], sizes = [2, 32], strides = [1, 1]} : vector<2x128xf32> to vector<2x32xf32>
    %cst_138 = arith.constant 5.000000e-01 : f32
    %416 = vector.broadcast %cst_138 : f32 to vector<2x32xf32>
    %417 = arith.mulf %416, %415 : vector<2x32xf32>
    %cst_139 = arith.constant 5.000000e-01 : f32
    %418 = vector.broadcast %cst_139 : f32 to vector<2x32xf32>
    %419 = arith.addf %417, %418 : vector<2x32xf32>
    %420 = vector.extract_strided_slice %414 {offsets = [0, 32], sizes = [2, 32], strides = [1, 1]} : vector<2x128xf32> to vector<2x32xf32>
    %cst_140 = arith.constant 5.000000e-01 : f32
    %421 = vector.broadcast %cst_140 : f32 to vector<2x32xf32>
    %422 = arith.mulf %421, %420 : vector<2x32xf32>
    %cst_141 = arith.constant 5.000000e-01 : f32
    %423 = vector.broadcast %cst_141 : f32 to vector<2x32xf32>
    %424 = arith.addf %422, %423 : vector<2x32xf32>
    %425 = vector.extract_strided_slice %414 {offsets = [0, 64], sizes = [2, 32], strides = [1, 1]} : vector<2x128xf32> to vector<2x32xf32>
    %426 = vector.extract_strided_slice %414 {offsets = [0, 96], sizes = [2, 32], strides = [1, 1]} : vector<2x128xf32> to vector<2x32xf32>
    %cst_142 = arith.constant 5.000000e-01 : f32
    %427 = vector.broadcast %cst_142 : f32 to vector<2x32xf32>
    %428 = arith.mulf %427, %426 : vector<2x32xf32>
    %cst_143 = arith.constant 5.000000e-01 : f32
    %429 = vector.broadcast %cst_143 : f32 to vector<2x32xf32>
    %430 = arith.addf %428, %429 : vector<2x32xf32>
    %431 = arith.mulf %424, %380 : vector<2x32xf32>
    %432 = arith.mulf %419, %425 : vector<2x32xf32>
    %433 = arith.addf %431, %432 : vector<2x32xf32>
    %434 = math.tanh %433 : vector<2x32xf32>
    %435 = arith.mulf %430, %434 : vector<2x32xf32>
    %cst_144 = arith.constant dense<0.000000e+00> : vector<2x128xf32>
    %436 = tpu.matmul %435, %22, %cst_144 {dimension_numbers = #tpu.dot_dimension_numbers<[1], [0], [0], [1], [0, 0, 1, 1], [], []>} : vector<2x32xf32>, vector<32x128xf32>, vector<2x128xf32> -> vector<2x128xf32>
    %cst_145 = arith.constant dense<0.000000e+00> : vector<2x128xf32>
    %437 = tpu.matmul %409, %26, %cst_145 {dimension_numbers = #tpu.dot_dimension_numbers<[1], [0], [0], [1], [0, 0, 1, 1], [], []>} : vector<2x32xf32>, vector<32x128xf32>, vector<2x128xf32> -> vector<2x128xf32>
    %438 = arith.addf %436, %437 : vector<2x128xf32>
    %439 = vector.broadcast %30 : vector<1x128xf32> to vector<2x128xf32>
    %440 = arith.addf %438, %439 : vector<2x128xf32>
    %441 = math.tanh %440 : vector<2x128xf32>
    %442 = vector.extract_strided_slice %441 {offsets = [0, 0], sizes = [2, 32], strides = [1, 1]} : vector<2x128xf32> to vector<2x32xf32>
    %cst_146 = arith.constant 5.000000e-01 : f32
    %443 = vector.broadcast %cst_146 : f32 to vector<2x32xf32>
    %444 = arith.mulf %443, %442 : vector<2x32xf32>
    %cst_147 = arith.constant 5.000000e-01 : f32
    %445 = vector.broadcast %cst_147 : f32 to vector<2x32xf32>
    %446 = arith.addf %444, %445 : vector<2x32xf32>
    %447 = vector.extract_strided_slice %441 {offsets = [0, 32], sizes = [2, 32], strides = [1, 1]} : vector<2x128xf32> to vector<2x32xf32>
    %cst_148 = arith.constant 5.000000e-01 : f32
    %448 = vector.broadcast %cst_148 : f32 to vector<2x32xf32>
    %449 = arith.mulf %448, %447 : vector<2x32xf32>
    %cst_149 = arith.constant 5.000000e-01 : f32
    %450 = vector.broadcast %cst_149 : f32 to vector<2x32xf32>
    %451 = arith.addf %449, %450 : vector<2x32xf32>
    %452 = vector.extract_strided_slice %441 {offsets = [0, 64], sizes = [2, 32], strides = [1, 1]} : vector<2x128xf32> to vector<2x32xf32>
    %453 = vector.extract_strided_slice %441 {offsets = [0, 96], sizes = [2, 32], strides = [1, 1]} : vector<2x128xf32> to vector<2x32xf32>
    %cst_150 = arith.constant 5.000000e-01 : f32
    %454 = vector.broadcast %cst_150 : f32 to vector<2x32xf32>
    %455 = arith.mulf %454, %453 : vector<2x32xf32>
    %cst_151 = arith.constant 5.000000e-01 : f32
    %456 = vector.broadcast %cst_151 : f32 to vector<2x32xf32>
    %457 = arith.addf %455, %456 : vector<2x32xf32>
    %458 = arith.mulf %451, %407 : vector<2x32xf32>
    %459 = arith.mulf %446, %452 : vector<2x32xf32>
    %460 = arith.addf %458, %459 : vector<2x32xf32>
    %461 = math.tanh %460 : vector<2x32xf32>
    %462 = arith.mulf %457, %461 : vector<2x32xf32>
    %463 = tpu.concatenate %91, %144, %197, %250, %303, %356, %409, %462 in 1 : vector<2x32xf32>, vector<2x32xf32>, vector<2x32xf32>, vector<2x32xf32>, vector<2x32xf32>, vector<2x32xf32>, vector<2x32xf32>, vector<2x32xf32> -> vector<2x256xf32>
    %c0_152 = arith.constant 0 : index
    %c0_153 = arith.constant 0 : index
    %464 = vector.load %arg9[%c0_152, %c0_153] : memref<2x256xf32, #tpu.memory_space<vmem>>, vector<2x256xf32>
    tpu.vector_store %arg9[%c0_152, %c0_153], %463 {strides = array<i32>} : memref<2x256xf32, #tpu.memory_space<vmem>>, vector<2x256xf32>,
    %465 = tpu.concatenate %435, %433 in 1 : vector<2x32xf32>, vector<2x32xf32> -> vector<2x64xf32>
    %466 = tpu.concatenate %462, %460 in 1 : vector<2x32xf32>, vector<2x32xf32> -> vector<2x64xf32>
    %467 = tpu.concatenate %465, %466 in 1 : vector<2x64xf32>, vector<2x64xf32> -> vector<2x128xf32>
    %c0_154 = arith.constant 0 : index
    %c0_155 = arith.constant 0 : index
    %468 = vector.load %arg10[%c0_154, %c0_155] : memref<2x128xf32, #tpu.memory_space<vmem>>, vector<2x128xf32>
    tpu.vector_store %arg10[%c0_154, %c0_155], %467 {strides = array<i32>} : memref<2x128xf32, #tpu.memory_space<vmem>>, vector<2x128xf32>,
    return
  }
  func.func @transform_0(%arg0: i32) -> (i32, i32) {
    %c0_i32 = arith.constant 0 : i32
    %c0_i32_0 = arith.constant 0 : i32
    return %arg0, %c0_i32 : i32, i32
  }
  func.func @transform_1(%arg0: i32) -> (i32, i32) {
    %c0_i32 = arith.constant 0 : i32
    %c0_i32_0 = arith.constant 0 : i32
    return %arg0, %c0_i32 : i32, i32
  }
  func.func @transform_2(%arg0: i32) -> (i32, i32) {
    %c0_i32 = arith.constant 0 : i32
    %c0_i32_0 = arith.constant 0 : i32
    %c0_i32_1 = arith.constant 0 : i32
    return %c0_i32, %c0_i32_0 : i32, i32
  }
  func.func @transform_3(%arg0: i32) -> (i32, i32) {
    %c0_i32 = arith.constant 0 : i32
    %c0_i32_0 = arith.constant 0 : i32
    %c0_i32_1 = arith.constant 0 : i32
    return %c0_i32, %c0_i32_0 : i32, i32
  }
  func.func @transform_4(%arg0: i32) -> (i32, i32) {
    %c0_i32 = arith.constant 0 : i32
    %c0_i32_0 = arith.constant 0 : i32
    %c0_i32_1 = arith.constant 0 : i32
    return %c0_i32, %c0_i32_0 : i32, i32
  }
  func.func @transform_5(%arg0: i32) -> (i32, i32, i32) {
    %c0_i32 = arith.constant 0 : i32
    %c0_i32_0 = arith.constant 0 : i32
    %c0_i32_1 = arith.constant 0 : i32
    %c0_i32_2 = arith.constant 0 : i32
    return %c0_i32, %c0_i32_0, %c0_i32_1 : i32, i32, i32
  }
  func.func @transform_6(%arg0: i32) -> (i32, i32, i32) {
    %c0_i32 = arith.constant 0 : i32
    %c0_i32_0 = arith.constant 0 : i32
    %c0_i32_1 = arith.constant 0 : i32
    %c0_i32_2 = arith.constant 0 : i32
    return %c0_i32, %c0_i32_0, %c0_i32_1 : i32, i32, i32
  }
  func.func @transform_7(%arg0: i32) -> (i32, i32, i32) {
    %c0_i32 = arith.constant 0 : i32
    %c0_i32_0 = arith.constant 0 : i32
    %c0_i32_1 = arith.constant 0 : i32
    %c0_i32_2 = arith.constant 0 : i32
    return %c0_i32, %c0_i32_0, %c0_i32_1 : i32, i32, i32
  }
  func.func @transform_8(%arg0: i32) -> (i32, i32) {
    %c0_i32 = arith.constant 0 : i32
    %c0_i32_0 = arith.constant 0 : i32
    return %arg0, %c0_i32 : i32, i32
  }
  func.func @transform_9(%arg0: i32) -> (i32, i32) {
    %c0_i32 = arith.constant 0 : i32
    %c0_i32_0 = arith.constant 0 : i32
    return %arg0, %c0_i32 : i32, i32
  }
}

</mosaic_0001>

<bundles_post_ra>
// kernel: sequential_encoder_forward.1
= control target key start
LH: loop header
LB: loop body
LE: loop exit
PB: predicated region body
PF: predicated region fallthrough
CT: control target
= control target key end

     0   :  { %15 = vsyncpa [#allocation3], 0  ;;  %s4107_s0 = inlined_call_operand.vmem [shape: s32[16,1], index: 0, kind: input, shape index: {}]   ;;  %s4108_s1 = inlined_call_operand.vmem [shape: f32[16,1], index: 1, kind: input, shape index: {}]   ;;  %s4109_s2 = inlined_call_operand.hbm [shape: f32[13,32], index: 2, kind: input, shape index: {}]   ;;  %s4110_s3 = inlined_call_operand.vmem [shape: f32[1,32], index: 3, kind: input, shape index: {}]   ;;  %s4111_s4 = inlined_call_operand.vmem [shape: f32[1,32], index: 4, kind: input, shape index: {}]   ;;  %s4112_s5 = inlined_call_operand.vmem [shape: f32[2,32,128], index: 5, kind: input, shape index: {}]   ;;  %s4113_s6 = inlined_call_operand.hbm [shape: f32[2,32,128], index: 6, kind: input, shape index: {}]   ;;  %s4114_s7 = inlined_call_operand.vmem [shape: f32[2,1,128], index: 7, kind: input, shape index: {}]   ;;  %s4115_s8 = inlined_call_operand.vmem [shape: f32[2,256], index: 8, kind: output, shape index: {0}]   ;;  %s4116_s9 = inlined_call_operand.vmem [shape: f32[2,128], index: 9, kind: output, shape index: {1}]  }
   0x1   :  { %16 = vsyncpa [#allocation5], 0  ;;  %s3523_s30 = smov [#allocation2]   ;;  %s3475_s13 = scalar_lea.hbm %s4109_s2, 256 }
   0x2   :  { %s26_s10 = sshll.u32 %s3523_s30, 4  ;;  %p3476_p0 = scmp.ne.s32.totalorder %s4109_s2, %s3475_s13  ;;  %s27_s10 = int_to_ptr.vmem [resolvable:$true] %s26_s10 }
   0x3   :  { %p3479_p1 = scmp.lt.u32.totalorder %s3475_s13, %s4109_s2 }
   0x5   :  { %p3481_p2 = pnand %p3479_p1, %p3476_p0 }
   0x7   :  { %3484 = shalt.err (!%p3481_p2)
}
   0x8   :  { %s3485_s18 = scalar_lea.vmem %s27_s10, 256  ;;  %p3490_p4 = scmp.lt.s32.totalorder %s27_s10, %s27_s10 }
   0x9   :  { %p3486_p3 = scmp.ne.s32.totalorder %s27_s10, %s3485_s18  ;;  %p3491_p5 = scmp.lt.s32.totalorder %s3485_s18, %s3485_s18 }
   0xb   :  { %p3492_p6 = por %p3491_p5, %p3490_p4 }
   0xd   :  { %p3493_p7 = pnand %p3492_p6, %p3486_p3 }
   0xf   :  { %3496 = shalt.err (!%p3493_p7)
}
  0x10   :  { %s3524_s19 = smov 128   ;;  %s3525_s20 = smov 8  }
  0x11   :  { %32 = dma.hbm_to_vmem [thread:$0]  %s4109_s2, 256, %s27_s10, [#allocation3], %s3524_s19, %s3524_s19, %s3525_s20  }
  0x12   :  { %s3526_s23 = smov [#allocation4]   ;;  %s3497_s27 = scalar_lea.hbm %s4113_s6, 1024 }
  0x13   :  { %s44_s24 = sshll.u32 %s3526_s23, 4  ;;  %p3498_p8 = scmp.ne.s32.totalorder %s4113_s6, %s3497_s27  ;;  %s45_s24 = int_to_ptr.vmem [resolvable:$true] %s44_s24 }
  0x14   :  { %p3501_p9 = scmp.lt.u32.totalorder %s3497_s27, %s4113_s6 }
  0x16   :  { %p3503_p10 = pnand %p3501_p9, %p3498_p8 }
  0x18   :  { %3506 = shalt.err (!%p3503_p10)
}
  0x19   :  { %s3507_s12 = scalar_lea.vmem %s45_s24, 1024  ;;  %p3512_p12 = scmp.lt.s32.totalorder %s45_s24, %s45_s24 }
  0x1a   :  { %p3508_p11 = scmp.ne.s32.totalorder %s45_s24, %s3507_s12  ;;  %p3513_p13 = scmp.lt.s32.totalorder %s3507_s12, %s3507_s12 }
  0x1c   :  { %p3514_p0 = por %p3513_p13, %p3512_p12 }
  0x1e   :  { %p3515_p1 = pnand %p3514_p0, %p3508_p11 }
  0x20   :  { %3518 = shalt.err (!%p3515_p1)
}
  0x21   :  { %50 = dma.hbm_to_vmem [thread:$0]  %s4113_s6, 1024, %s45_s24, [#allocation5], %s3524_s19, %s3524_s19, %s3525_s20  }
  0x22   :  { %3519 = dma.done.wait [#allocation3], 256  }
  0x23   :  { %3520 = vsyncadd [#allocation3], 4294967040 }
  0x24   :  { %3521 = dma.done.wait [#allocation5], 1024  }
  0x25   :  { %3522 = vsyncadd [#allocation5], 4294966272  ;;  %v3527_v0 = vmov 0   ;;  %v59_v1 = vld [vmem:[%s4107_s0] sm:$0xff]  ;;  %vm105_vm0 = vcmask 1044480   ;;  %vm3528_vm1 = vmmov 1   ;;  %v61_v8 = vlaneseq }
  0x26   :  { %3376 = vset.pattern.permute.xlu0 %v3527_v0  ;;  %3377 = vset.pattern.permute.xlu1 %v3527_v0  ;;  %v75_v2 = vld [vmem:[#allocation2] sm:$0xff]  ;;  %v76_v3 = vld [vmem:[#allocation2 + $0x8] sm:$0x1f]  ;;  %vm3207_vm2 = vmpackc.low %vm105_vm0, %vm3528_vm1  ;;  %vm98_vm3 = vcmask 105472   ;;  %v3529_v11 = vmov 0.0   ;;  %v3530_v20 = vmov 0.0|0.0  }
  0x27   :  { %64 = vperm.xlu0 %3376, %v59_v1   ;;  %v60_v4 = vld [vmem:[%s4107_s0 + $0x8] sm:$0xff]  ;;  %v3206_v5 = vpack.c.bf16 %v76_v3, %v75_v2  ;;  %v77_v6 = vld [vmem:[%s4108_s1] sm:$0xff]  ;;  %v62_v9 = vand.u32 127, %v61_v8  ;;  %v204_v17 = vld [vmem:[#allocation4] sm:$0xff]  ;;  %vm3531_vm6 = vmmov 0   ;;  %vm222_vm7 = vcmask 261120  }
  0x28   :  { %82 = vperm.xlu1 %3377, %v77_v6   ;;  %v78_v7 = vld [vmem:[%s4108_s1 + $0x8] sm:$0xff]  ;;  %v195_v15 = vld [vmem:[%s4112_s5] sm:$0xff]  ;;  %v205_v19 = vld [vmem:[#allocation4 + $0x8] sm:$0xff]  ;;  %s3533_s11 = smov 32   ;;  %vm496_vm8 = vcmask 1041409   ;;  %vm2698_vm9 = vcmask 523264  }
  0x29   :  { %3208 = vmatprep.subr.msk.bf16.mxu0 %vm3207_vm2, %v3206_v5  ;;  %v196_v16 = vld [vmem:[%s4112_s5 + $0x8] sm:$0xff]  ;;  %v3630_v21 = vpack.c.bf16 %v205_v19, %v204_v17  ;;  %v197_v22 = vld [vmem:[%s4112_s5 + $0x10] sm:$0xff]  ;;  %v198_v23 = vld [vmem:[%s4112_s5 + $0x18] sm:$0xff]  ;;  %vm2700_vm10 = vcmask 785408  }
  0x2a   :  { %3211 = vmatpush3.bf16.msk.msra.mxu0 %vm3207_vm2, %v3206_v5  ;;  %v3212_v18 = vpack.c.bf16 %v196_v16, %v195_v15  ;;  %v206_v24 = vld [vmem:[#allocation4 + $0x10] sm:$0xff]  ;;  %v3216_v25 = vpack.c.bf16 %v198_v23, %v197_v22  ;;  %v207_v26 = vld [vmem:[#allocation4 + $0x18] sm:$0xff]  ;;  %v210_v5 = vld [vmem:[#allocation4 + $0x28] sm:$0xff] }
  0x2b   :  { %67 = vperm.xlu0 %3376, %v60_v4   ;;  %3220 = vmatprep.subr.bf16.mxu0 %v3530_v20  ;;  %v3640_v27 = vpack.c.bf16 %v207_v26, %v206_v24  ;;  %v2757_v29 = vld [vmem:[%s4110_s3] ss:$0 sm:$0xff]  ;;  %v209_v4 = vld [vmem:[#allocation4 + $0x20] sm:$0xff]  ;;  %v212_v8 = vld [vmem:[#allocation4 + $0x38] sm:$0xff] }
  0x2c   :  { %87 = vperm.xlu1 %3377, %v78_v7   ;;  %3213 = vmatprep.subr.bf16.mxu1 %v3212_v18  ;;  %v2761_v34 = vld [vmem:[%s4111_s4] ss:$0 sm:$0xff]  ;;  %s3532_s4 = smov 64   ;;  %v3679_v7 = vpack.c.bf16 %v210_v5, %v209_v4 }
  0x2d   :  { %3215 = vmatpush3.bf16.msra.mxu1 %v3212_v18  ;;  %v2767_v44 = vld [vmem:[%s4114_s7] ss:$0 sm:$0xff] }
  0x2e   :  { %3217 = vmatprep.subr.bf16.mxu1 %v3216_v25  ;;  %v211_v6 = vld [vmem:[#allocation4 + $0x30] sm:$0xff] }
  0x2f   :  { %v3696_v15 = vpack.c.bf16 %v212_v8, %v211_v6 }
  0x31   :  { %3219 = vmatpush3.bf16.msra.mxu1 %v3216_v25 }
  0x32   :  { %3226 = vmatprep.subr.bf16.mxu1 %v3530_v20 }
  0xa6   :  { %v65_v10 = vpop.permute.xlu0 %64 }
  0xa7   :  { %vm69_vm4 = vcmp.eq.s32.totalorder %v65_v10, %v62_v9  ;;  %v83_v28 = vpop.permute.xlu1 %82  ;;  %v2763_v10 = vld [vmem:[%s4112_s5 + $0x28] sm:$0xff] }
  0xa8   :  { %v2755_v12 = vsel %vm69_vm4, 1.0, %v3529_v11  ;;  %v96_v32 = vmul.f32 %v2757_v29, %v83_v28 }
  0xa9   :  { %2928 = vmatprep.mubr.msk.f32.mxu0 %vm98_vm3, %v2755_v12 }
  0xaa   :  { %v68_v13 = vpop.permute.xlu0 %67 }
  0xab   :  { %vm70_vm5 = vcmp.eq.s32.totalorder %v68_v13, %v62_v9  ;;  %v88_v30 = vpop.permute.xlu1 %87  ;;  %v2762_v9 = vld [vmem:[%s4112_s5 + $0x20] sm:$0xff]  ;;  %v2764_v13 = vld [vmem:[%s4112_s5 + $0x30] sm:$0xff] }
  0xac   :  { %v2756_v14 = vsel %vm70_vm5, 1.0, %v3529_v11  ;;  %v97_v31 = vmul.f32 %v2757_v29, %v88_v30  ;;  %v3687_v12 = vpack.c.bf16 %v2763_v10, %v2762_v9 }
  0xad   :  { %2929 = vmatmul.mubr.msk.f32.vlgmr.msra.gmra.mrb[0].mxu0 %vm98_vm3, %v2756_v14  ;;  %v2765_v14 = vld [vmem:[%s4112_s5 + $0x38] sm:$0xff] }
  0xae   :  { %3222 = vmatpush3.bf16.msra.mxu0 %v3630_v21  ;;  %2950 = vmatprep.mubr.msk.f32.mxu0 %vm3531_vm6, %v3529_v11  ;;  %v3701_v16 = vpack.c.bf16 %v2765_v14, %v2764_v13 }
  0xaf   :  { %3223 = vmatprep.subr.bf16.mxu0 %v3530_v20 }
  0xb2   :  { %3225 = vmatpush3.bf16.msra.mxu0 %v3640_v27 }
  0xb3   :  { %3232 = vmatprep.subr.bf16.mxu0 %v3530_v20 }
  0xb5   :  { %2951 = vmatmul.mubr.f32.vlgmr.msra.gmra.mrb[2].mxu0 %v3529_v11 }
  0xb6   :  { %2972 = vmatprep.mubr.msk.f32.mxu0 %vm3531_vm6, %v3529_v11  ;;  %3234 = vmatpush3.bf16.msra.mxu0 %v3687_v12 }
  0xb7   :  { %3235 = vmatprep.subr.bf16.mxu0 %v3530_v20 }
  0xba   :  { %3237 = vmatpush3.bf16.msra.mxu0 %v3701_v16 }
  0xbb   :  { %3244 = vmatprep.subr.bf16.mxu0 %v3530_v20 }
 0x180   :  { %v2930_v33 = vpop.f32.mrb[0].mxu0 }
 0x181   :  { %v181_v35 = vadd.f32 %v2930_v33, %v97_v31  ;;  %v175_v36 = vpop.f32.mrb[1].mxu0  ;;  %v3735_v31 = vld [vmem:[%s4114_s7 + $0x1] ss:$0 sm:$0xff] }
 0x182   :  { %v176_v37 = vadd.f32 %v175_v36, %v96_v32 }
 0x183   :  { %v192_v38 = vadd.f32 %v2761_v34, %v181_v35 }
 0x184   :  { %v191_v39 = vadd.f32 %v2761_v34, %v176_v37 }
 0x185   :  { %v194_v41 = vmul.f32 5.656854, %v192_v38 }
 0x186   :  { %v193_v40 = vmul.f32 5.656854, %v191_v39 }
 0x188   :  { %2939 = vmatprep.mubr.msk.f32.mxu1 %vm222_vm7, %v193_v40  ;;  %v373_v42 = vpop.f32.mrb[2].mxu0 }
 0x189   :  { %2940 = vmatmul.mubr.msk.f32.vlgmr.msra.gmra.mrb[0].mxu1 %vm222_vm7, %v194_v41  ;;  %v2952_v43 = vpop.f32.mrb[3].mxu0  ;;  %v378_v45 = vrot.slane %v373_v42, 1 }
 0x18a   :  { %2961 = vmatprep.mubr.msk.f32.mxu1 %vm3531_vm6, %v3529_v11  ;;  %3228 = vmatpush3.bf16.msra.mxu1 %v3679_v7 }
 0x18b   :  { %3229 = vmatprep.subr.bf16.mxu1 %v3530_v20 }
 0x18e   :  { %3231 = vmatpush3.bf16.msra.mxu1 %v3696_v15 }
 0x18f   :  { %3238 = vmatprep.subr.bf16.mxu1 %v3530_v20 }
 0x191   :  { %2962 = vmatmul.mubr.f32.vlgmr.msra.gmra.mrb[2].mxu1 %v3529_v11 }
 0x192   :  { %3240 = vmatpush3.bf16.msra.mxu1 %v3630_v21  ;;  %2983 = vmatprep.mubr.msk.f32.mxu1 %vm3531_vm6, %v3529_v11 }
 0x193   :  { %3241 = vmatprep.subr.bf16.mxu1 %v3530_v20 }
 0x196   :  { %3243 = vmatpush3.bf16.msra.mxu1 %v3640_v27 }
 0x197   :  { %3250 = vmatprep.subr.bf16.mxu1 %v3530_v20 }
 0x25c   :  { %v2941_v46 = vpop.f32.mrb[0].mxu1 }
 0x25d   :  { %v3663_v47 = vadd.f32 %v2941_v46, %v2767_v44  ;;  %v295_v48 = vpop.f32.mrb[1].mxu1 }
 0x25e   :  { %v3665_v49 = vadd.f32 %v2767_v44, %v295_v48 }
 0x25f   :  { %v382_v50 = vadd.f32 %v378_v45, %v3663_v47 }
 0x260   :  { %v381_v51 = vadd.f32 %v373_v42, %v3665_v49 }
 0x261   :  { %3378 = vtanh.f32 %v382_v50 }
 0x262   :  { %3380 = vtanh.f32 %v381_v51 }
 0x264   :  { %v489_v28 = vpop.f32.mrb[2].mxu1 }
 0x265   :  { %v2963_v29 = vpop.f32.mrb[3].mxu1 }
 0x26b   :  { %v3379_v52 = vpop.eup %3378 }
 0x26c   :  { %v3381_v53 = vpop.eup %3380  ;;  %395 = vrot.lane.b32.xlu0 %v3379_v52, %s3532_s4  ;;  %v386_v54 = vmul.f32 0.5, %v3379_v52 }
 0x26d   :  { %393 = vrot.lane.b32.xlu1 %v3381_v53, %s3532_s4  ;;  %v385_v55 = vmul.f32 0.5, %v3381_v53 }
 0x26e   :  { %v388_v56 = vadd.f32 0.5, %v386_v54 }
 0x26f   :  { %v387_v58 = vadd.f32 0.5, %v385_v55 }
 0x270   :  { %v390_v62 = vmul.f32 0.0, %v388_v56 }
 0x271   :  { %v389_v0 = vmul.f32 0.0, %v387_v58 }
 0x2de   :  { %v396_v57 = vpop.permute.xlu0 %395 }
 0x2df   :  { %v400_v59 = vmul.f32 %v396_v57, %v388_v56  ;;  %v394_v60 = vpop.permute.xlu1 %393 }
 0x2e0   :  { %v399_v61 = vmul.f32 %v394_v60, %v387_v58 }
 0x2e1   :  { %405 = vrot.lane.b32.xlu0 %v400_v59, %s3533_s11 }
 0x2e2   :  { %403 = vrot.lane.b32.xlu1 %v399_v61, %s3533_s11 }
 0x353   :  { %v406_v63 = vpop.permute.xlu0 %405 }
 0x354   :  { %v3673_v1 = vadd.f32 %v406_v63, %v390_v62  ;;  %v404_v2 = vpop.permute.xlu1 %403 }
 0x355   :  { %v3675_v3 = vadd.f32 %v404_v2, %v389_v0 }
 0x356   :  { %3382 = vtanh.f32 %v3673_v1  ;;  %v684_v62 = vrot.slane %v3673_v1, 7 }
 0x357   :  { %3384 = vtanh.f32 %v3675_v3 }
 0x360   :  { %v3383_v17 = vpop.eup %3382 }
 0x361   :  { %v3385_v18 = vpop.eup %3384  ;;  %417 = vrot.lane.b32.xlu0 %v3383_v17, %s3532_s4 }
 0x362   :  { %415 = vrot.lane.b32.xlu1 %v3385_v18, %s3532_s4 }
 0x3d3   :  { %v418_v19 = vpop.permute.xlu0 %417 }
 0x3d4   :  { %v422_v22 = vmul.f32 %v418_v19, %v388_v56  ;;  %v416_v23 = vpop.permute.xlu1 %415 }
 0x3d5   :  { %v421_v24 = vmul.f32 %v416_v23, %v387_v58  ;;  %v683_v58 = vrot.slane %v3675_v3, 7 }
 0x3d6   :  { %v495_v25 = vrot.slane %v422_v22, 7 }
 0x3d8   :  { %v497_v26 = vsel %vm496_vm8, %v495_v25, %v421_v24 }
 0x3d9   :  { %498 = vrot.lane.b32.xlu0 %v497_v26, %s3533_s11 }
 0x44b   :  { %v499_v30 = vpop.permute.xlu0 %498 }
 0x44c   :  { %2973 = vmatmul.mubr.msk.f32.vlgmr.msra.gmra.mrb[4].mxu0 %vm222_vm7, %v499_v30  ;;  %2984 = vmatmul.mubr.msk.f32.vlgmr.msra.gmra.mrb[4].mxu1 %vm222_vm7, %v499_v30 }
 0x44d   :  { %3246 = vmatpush3.bf16.msra.mxu0 %v3679_v7  ;;  %3252 = vmatpush3.bf16.msra.mxu1 %v3687_v12 }
 0x44e   :  { %3247 = vmatprep.subr.bf16.mxu0 %v3530_v20  ;;  %2994 = vmatprep.mubr.msk.f32.mxu0 %vm3531_vm6, %v3529_v11 }
 0x44f   :  { %3253 = vmatprep.subr.bf16.mxu1 %v3530_v20  ;;  %3005 = vmatprep.mubr.msk.f32.mxu1 %vm3531_vm6, %v3529_v11 }
 0x451   :  { %3249 = vmatpush3.bf16.msra.mxu0 %v3696_v15  ;;  %3255 = vmatpush3.bf16.msra.mxu1 %v3701_v16 }
 0x452   :  { %3256 = vmatprep.subr.bf16.mxu0 %v3530_v20  ;;  %3262 = vmatprep.subr.bf16.mxu1 %v3530_v20 }
 0x51f   :  { %v568_v32 = vpop.f32.mrb[4].mxu0  ;;  %v665_v33 = vpop.f32.mrb[4].mxu1 }
 0x520   :  { %v569_v34 = vadd.f32 %v568_v32, %v489_v28  ;;  %v670_v35 = vrot.slane %v665_v33, 7  ;;  %v2974_v36 = vpop.f32.mrb[5].mxu0  ;;  %v2985_v37 = vpop.f32.mrb[5].mxu1  ;;  %v674_v40 = vadd.f32 %v665_v33, %v3663_v47 }
 0x522   :  { %v578_v38 = vadd.f32 %v3735_v31, %v569_v34  ;;  %v673_v39 = vadd.f32 %v670_v35, %v3665_v49 }
 0x524   :  { %3386 = vtanh.f32 %v578_v38 }
 0x525   :  { %3388 = vtanh.f32 %v673_v39 }
 0x526   :  { %3390 = vtanh.f32 %v674_v40 }
 0x52e   :  { %v3387_v41 = vpop.eup %3386 }
 0x52f   :  { %v3389_v42 = vpop.eup %3388  ;;  %584 = vrot.lane.b32.xlu1 %v3387_v41, %s3532_s4  ;;  %v580_v44 = vmul.f32 0.5, %v3387_v41 }
 0x530   :  { %691 = vrot.lane.b32.xlu0 %v3389_v42, %s3532_s4  ;;  %v3391_v43 = vpop.eup %3390  ;;  %v677_v45 = vmul.f32 0.5, %v3389_v42 }
 0x531   :  { %v581_v46 = vadd.f32 0.5, %v580_v44  ;;  %v678_v48 = vmul.f32 0.5, %v3391_v43 }
 0x532   :  { %v679_v50 = vadd.f32 0.5, %v677_v45 }
 0x533   :  { %693 = vrot.lane.b32.xlu1 %v3391_v43, %s3532_s4  ;;  %v680_v55 = vadd.f32 0.5, %v678_v48  ;;  %v582_v59 = vmul.f32 0.0, %v581_v46 }
 0x534   :  { %v687_v60 = vmul.f32 %v683_v58, %v679_v50 }
 0x535   :  { %v688_v4 = vmul.f32 %v684_v62, %v680_v55 }
 0x5a1   :  { %v585_v51 = vpop.permute.xlu1 %584 }
 0x5a2   :  { %v692_v52 = vpop.permute.xlu0 %691  ;;  %v587_v53 = vmul.f32 %v585_v51, %v581_v46 }
 0x5a3   :  { %v697_v54 = vmul.f32 %v692_v52, %v679_v50 }
 0x5a4   :  { %589 = vrot.lane.b32.xlu0 %v587_v53, %s3533_s11 }
 0x5a5   :  { %701 = vrot.lane.b32.xlu1 %v697_v54, %s3533_s11  ;;  %v694_v56 = vpop.permute.xlu1 %693 }
 0x5a6   :  { %v698_v57 = vmul.f32 %v694_v56, %v680_v55 }
 0x5a8   :  { %703 = vrot.lane.b32.xlu0 %v698_v57, %s3533_s11 }
 0x616   :  { %v590_v61 = vpop.permute.xlu0 %589 }
 0x617   :  { %v702_v63 = vpop.permute.xlu1 %701  ;;  %v3748_v0 = vadd.f32 %v590_v61, %v582_v59 }
 0x618   :  { %v3750_v2 = vadd.f32 %v702_v63, %v687_v60 }
 0x619   :  { %3392 = vtanh.f32 %v3748_v0 }
 0x61a   :  { %3394 = vtanh.f32 %v3750_v2  ;;  %v704_v5 = vpop.permute.xlu0 %703  ;;  %v980_v57 = vrot.slane %v3750_v2, 7 }
 0x61b   :  { %v3754_v6 = vadd.f32 %v704_v5, %v688_v4 }
 0x61d   :  { %3396 = vtanh.f32 %v3754_v6  ;;  %v981_v59 = vrot.slane %v3754_v6, 7 }
 0x623   :  { %v3393_v3 = vpop.eup %3392 }
 0x624   :  { %v3395_v8 = vpop.eup %3394  ;;  %595 = vrot.lane.b32.xlu1 %v3393_v3, %s3532_s4 }
 0x625   :  { %713 = vrot.lane.b32.xlu0 %v3395_v8, %s3532_s4 }
 0x627   :  { %v3397_v1 = vpop.eup %3396 }
 0x628   :  { %715 = vrot.lane.b32.xlu1 %v3397_v1, %s3532_s4 }
 0x696   :  { %v596_v9 = vpop.permute.xlu1 %595 }
 0x697   :  { %v714_v10 = vpop.permute.xlu0 %713  ;;  %v598_v13 = vmul.f32 %v596_v9, %v581_v46 }
 0x698   :  { %v719_v14 = vmul.f32 %v714_v10, %v679_v50 }
 0x699   :  { %722 = vrot.lane.b32.xlu0 %v598_v13, %s3533_s11 }
 0x69a   :  { %v716_v17 = vpop.permute.xlu1 %715  ;;  %v798_v18 = vrot.slane %v719_v14, 1 }
 0x69b   :  { %v720_v19 = vmul.f32 %v716_v17, %v680_v55 }
 0x69d   :  { %v799_v22 = vsel %vm496_vm8, %v720_v19, %v798_v18 }
 0x69e   :  { %800 = vrot.lane.b32.xlu1 %v799_v22, %s3533_s11 }
 0x70b   :  { %v3763_v23 = vpop.permute.xlu0 %722 }
 0x70c   :  { %2995 = vmatmul.mubr.msk.f32.vlgmr.msra.gmra.mrb[6].mxu0 %vm222_vm7, %v3763_v23 }
 0x70d   :  { %3258 = vmatpush3.bf16.msra.mxu0 %v3630_v21  ;;  %3016 = vmatprep.mubr.msk.f32.mxu0 %vm3531_vm6, %v3529_v11 }
 0x70e   :  { %3259 = vmatprep.subr.bf16.mxu0 %v3530_v20 }
 0x710   :  { %v801_v24 = vpop.permute.xlu1 %800 }
 0x711   :  { %3261 = vmatpush3.bf16.msra.mxu0 %v3640_v27  ;;  %3006 = vmatmul.mubr.msk.f32.vlgmr.msra.gmra.mrb[6].mxu1 %vm222_vm7, %v801_v24 }
 0x712   :  { %3264 = vmatpush3.bf16.msra.mxu1 %v3679_v7  ;;  %3027 = vmatprep.mubr.msk.f32.mxu1 %vm3531_vm6, %v3529_v11 }
 0x713   :  { %3265 = vmatprep.subr.bf16.mxu1 %v3530_v20  ;;  %3268 = vmatprep.subr.bf16.mxu0 %v3530_v20 }
 0x714   :  { %3017 = vmatmul.mubr.msk.f32.vlgmr.msra.gmra.mrb[8].mxu0 %vm222_vm7, %v801_v24 }
 0x715   :  { %3270 = vmatpush3.bf16.msra.mxu0 %v3687_v12  ;;  %3038 = vmatprep.mubr.msk.f32.mxu0 %vm3531_vm6, %v3529_v11 }
 0x716   :  { %3267 = vmatpush3.bf16.msra.mxu1 %v3696_v15  ;;  %3271 = vmatprep.subr.bf16.mxu0 %v3530_v20 }
 0x717   :  { %3274 = vmatprep.subr.bf16.mxu1 %v3530_v20 }
 0x719   :  { %3273 = vmatpush3.bf16.msra.mxu0 %v3701_v16 }
 0x71a   :  { %3280 = vmatprep.subr.bf16.mxu0 %v3530_v20 }
 0x7df   :  { %v792_v25 = vpop.f32.mrb[6].mxu0 }
 0x7e0   :  { %v2996_v26 = vpop.f32.mrb[7].mxu0 }
 0x7e4   :  { %v870_v28 = vpop.f32.mrb[6].mxu1 }
 0x7e5   :  { %v871_v29 = vadd.f32 %v870_v28, %v792_v25  ;;  %v3007_v30 = vpop.f32.mrb[7].mxu1 }
 0x7e7   :  { %v874_v32 = vadd.f32 %v3735_v31, %v871_v29  ;;  %v961_v33 = vpop.f32.mrb[8].mxu0 }
 0x7e8   :  { %v966_v34 = vrot.slane %v961_v33, 6  ;;  %v967_v35 = vrot.slane %v961_v33, 7  ;;  %v3018_v36 = vpop.f32.mrb[9].mxu0 }
 0x7e9   :  { %3398 = vtanh.f32 %v874_v32 }
 0x7ea   :  { %v970_v37 = vadd.f32 %v966_v34, %v3665_v49  ;;  %v971_v38 = vadd.f32 %v967_v35, %v3663_v47 }
 0x7ec   :  { %3400 = vtanh.f32 %v970_v37 }
 0x7ed   :  { %3402 = vtanh.f32 %v971_v38 }
 0x7f3   :  { %v3399_v39 = vpop.eup %3398 }
 0x7f4   :  { %880 = vrot.lane.b32.xlu0 %v3399_v39, %s3532_s4  ;;  %v876_v42 = vmul.f32 0.5, %v3399_v39 }
 0x7f6   :  { %v3401_v40 = vpop.eup %3400  ;;  %v877_v44 = vadd.f32 0.5, %v876_v42 }
 0x7f7   :  { %v3403_v41 = vpop.eup %3402  ;;  %988 = vrot.lane.b32.xlu1 %v3401_v40, %s3532_s4  ;;  %v974_v43 = vmul.f32 0.5, %v3401_v40 }
 0x7f8   :  { %990 = vrot.lane.b32.xlu0 %v3403_v41, %s3532_s4  ;;  %v975_v45 = vmul.f32 0.5, %v3403_v41  ;;  %v878_v56 = vmul.f32 %v877_v44, %v3748_v0 }
 0x7f9   :  { %v976_v50 = vadd.f32 0.5, %v974_v43 }
 0x7fa   :  { %v977_v52 = vadd.f32 0.5, %v975_v45 }
 0x7fb   :  { %v984_v61 = vmul.f32 %v980_v57, %v976_v50 }
 0x7fc   :  { %v985_v63 = vmul.f32 %v981_v59, %v977_v52 }
 0x866   :  { %v881_v46 = vpop.permute.xlu0 %880 }
 0x867   :  { %v883_v48 = vmul.f32 %v881_v46, %v877_v44 }
 0x869   :  { %v989_v51 = vpop.permute.xlu1 %988  ;;  %885 = vrot.lane.b32.xlu1 %v883_v48, %s3533_s11 }
 0x86a   :  { %v994_v53 = vmul.f32 %v989_v51, %v976_v50  ;;  %v991_v54 = vpop.permute.xlu0 %990 }
 0x86b   :  { %v995_v55 = vmul.f32 %v991_v54, %v977_v52 }
 0x86c   :  { %998 = vrot.lane.b32.xlu0 %v994_v53, %s3533_s11 }
 0x86d   :  { %1000 = vrot.lane.b32.xlu1 %v995_v55, %s3533_s11 }
 0x8db   :  { %v886_v58 = vpop.permute.xlu1 %885 }
 0x8dc   :  { %v3799_v60 = vadd.f32 %v886_v58, %v878_v56 }
 0x8de   :  { %3404 = vtanh.f32 %v3799_v60  ;;  %v999_v62 = vpop.permute.xlu0 %998 }
 0x8df   :  { %v3802_v4 = vadd.f32 %v999_v62, %v984_v61  ;;  %v1001_v5 = vpop.permute.xlu1 %1000 }
 0x8e0   :  { %v3804_v3 = vadd.f32 %v1001_v5, %v985_v63 }
 0x8e1   :  { %3406 = vtanh.f32 %v3802_v4  ;;  %v1278_v56 = vrot.slane %v3802_v4, 7 }
 0x8e2   :  { %3408 = vtanh.f32 %v3804_v3  ;;  %v1279_v61 = vrot.slane %v3804_v3, 7 }
 0x8e8   :  { %v3405_v0 = vpop.eup %3404 }
 0x8e9   :  { %891 = vrot.lane.b32.xlu0 %v3405_v0, %s3532_s4 }
 0x8eb   :  { %v3407_v2 = vpop.eup %3406 }
 0x8ec   :  { %v3409_v6 = vpop.eup %3408  ;;  %1010 = vrot.lane.b32.xlu1 %v3407_v2, %s3532_s4 }
 0x8ed   :  { %1012 = vrot.lane.b32.xlu0 %v3409_v6, %s3532_s4 }
 0x95b   :  { %v892_v8 = vpop.permute.xlu0 %891 }
 0x95c   :  { %v3811_v1 = vmul.f32 %v892_v8, %v877_v44 }
 0x95e   :  { %v1011_v9 = vpop.permute.xlu1 %1010  ;;  %1019 = vrot.lane.b32.xlu1 %v3811_v1, %s3533_s11 }
 0x95f   :  { %v1016_v10 = vmul.f32 %v1011_v9, %v976_v50  ;;  %v1013_v13 = vpop.permute.xlu0 %1012 }
 0x960   :  { %v1017_v14 = vmul.f32 %v1013_v13, %v977_v52 }
 0x961   :  { %v1095_v17 = vrot.slane %v1016_v10, 2 }
 0x962   :  { %v1096_v18 = vrot.slane %v1017_v14, 1 }
 0x964   :  { %v1097_v19 = vsel %vm496_vm8, %v1096_v18, %v1095_v17 }
 0x965   :  { %1098 = vrot.lane.b32.xlu0 %v1097_v19, %s3533_s11 }
 0x9d0   :  { %v1020_v22 = vpop.permute.xlu1 %1019 }
 0x9d1   :  { %3028 = vmatmul.mubr.msk.f32.vlgmr.msra.gmra.mrb[8].mxu1 %vm222_vm7, %v1020_v22 }
 0x9d2   :  { %3276 = vmatpush3.bf16.msra.mxu1 %v3630_v21  ;;  %3049 = vmatprep.mubr.msk.f32.mxu1 %vm3531_vm6, %v3529_v11 }
 0x9d3   :  { %3277 = vmatprep.subr.bf16.mxu1 %v3530_v20 }
 0x9d6   :  { %3279 = vmatpush3.bf16.msra.mxu1 %v3640_v27 }
 0x9d7   :  { %v1099_v24 = vpop.permute.xlu0 %1098  ;;  %3286 = vmatprep.subr.bf16.mxu1 %v3530_v20 }
 0x9d8   :  { %3039 = vmatmul.mubr.msk.f32.vlgmr.msra.gmra.mrb[10].mxu0 %vm222_vm7, %v1099_v24 }
 0x9d9   :  { %3050 = vmatmul.mubr.msk.f32.vlgmr.msra.gmra.mrb[10].mxu1 %vm222_vm7, %v1099_v24  ;;  %3282 = vmatpush3.bf16.msra.mxu0 %v3679_v7 }
 0x9da   :  { %3283 = vmatprep.subr.bf16.mxu0 %v3530_v20  ;;  %3060 = vmatprep.mubr.msk.f32.mxu0 %vm3531_vm6, %v3529_v11 }
 0x9db   :  { %3288 = vmatpush3.bf16.msra.mxu1 %v3687_v12  ;;  %3071 = vmatprep.mubr.msk.f32.mxu1 %vm3531_vm6, %v3529_v11 }
 0x9dc   :  { %3289 = vmatprep.subr.bf16.mxu1 %v3530_v20 }
 0x9dd   :  { %3285 = vmatpush3.bf16.msra.mxu0 %v3696_v15 }
 0x9de   :  { %3292 = vmatprep.subr.bf16.mxu0 %v3530_v20 }
 0x9df   :  { %3291 = vmatpush3.bf16.msra.mxu1 %v3701_v16 }
 0x9e0   :  { %3298 = vmatprep.subr.bf16.mxu1 %v3530_v20 }
 0xaa4   :  { %v1089_v25 = vpop.f32.mrb[8].mxu1 }
 0xaa5   :  { %v3029_v26 = vpop.f32.mrb[9].mxu1 }
 0xaab   :  { %v1168_v28 = vpop.f32.mrb[10].mxu0 }
 0xaac   :  { %v1169_v29 = vadd.f32 %v1168_v28, %v1089_v25  ;;  %v1259_v30 = vpop.f32.mrb[10].mxu1  ;;  %v3040_v32 = vpop.f32.mrb[11].mxu0 }
 0xaad   :  { %v1264_v33 = vrot.slane %v1259_v30, 5  ;;  %v1265_v34 = vrot.slane %v1259_v30, 6  ;;  %v3051_v35 = vpop.f32.mrb[11].mxu1 }
 0xaae   :  { %v1172_v36 = vadd.f32 %v3735_v31, %v1169_v29 }
 0xaaf   :  { %v1268_v37 = vadd.f32 %v1264_v33, %v3665_v49  ;;  %v1269_v38 = vadd.f32 %v1265_v34, %v3663_v47 }
 0xab0   :  { %3410 = vtanh.f32 %v1172_v36 }
 0xab1   :  { %3412 = vtanh.f32 %v1268_v37 }
 0xab2   :  { %3414 = vtanh.f32 %v1269_v38 }
 0xaba   :  { %v3411_v39 = vpop.eup %3410 }
 0xabb   :  { %v3413_v40 = vpop.eup %3412  ;;  %1178 = vrot.lane.b32.xlu1 %v3411_v39, %s3532_s4  ;;  %v1174_v42 = vmul.f32 0.5, %v3411_v39 }
 0xabc   :  { %1286 = vrot.lane.b32.xlu0 %v3413_v40, %s3532_s4  ;;  %v3415_v41 = vpop.eup %3414  ;;  %v1272_v43 = vmul.f32 0.5, %v3413_v40 }
 0xabd   :  { %v1175_v44 = vadd.f32 0.5, %v1174_v42  ;;  %v1273_v45 = vmul.f32 0.5, %v3415_v41 }
 0xabe   :  { %v1274_v46 = vadd.f32 0.5, %v1272_v43 }
 0xabf   :  { %1288 = vrot.lane.b32.xlu1 %v3415_v41, %s3532_s4  ;;  %v1275_v53 = vadd.f32 0.5, %v1273_v45  ;;  %v1176_v57 = vmul.f32 %v1175_v44, %v3799_v60 }
 0xac0   :  { %v1282_v58 = vmul.f32 %v1278_v56, %v1274_v46 }
 0xac1   :  { %v1283_v0 = vmul.f32 %v1279_v61, %v1275_v53 }
 0xb2d   :  { %v1179_v48 = vpop.permute.xlu1 %1178 }
 0xb2e   :  { %v1287_v50 = vpop.permute.xlu0 %1286  ;;  %v1181_v51 = vmul.f32 %v1179_v48, %v1175_v44 }
 0xb2f   :  { %v1292_v52 = vmul.f32 %v1287_v50, %v1274_v46 }
 0xb30   :  { %1183 = vrot.lane.b32.xlu0 %v1181_v51, %s3533_s11 }
 0xb31   :  { %1296 = vrot.lane.b32.xlu1 %v1292_v52, %s3533_s11  ;;  %v1289_v54 = vpop.permute.xlu1 %1288 }
 0xb32   :  { %v1293_v55 = vmul.f32 %v1289_v54, %v1275_v53 }
 0xb34   :  { %1298 = vrot.lane.b32.xlu0 %v1293_v55, %s3533_s11 }
 0xba2   :  { %v1184_v59 = vpop.permute.xlu0 %1183 }
 0xba3   :  { %v1297_v62 = vpop.permute.xlu1 %1296  ;;  %v3850_v63 = vadd.f32 %v1184_v59, %v1176_v57 }
 0xba4   :  { %v3852_v5 = vadd.f32 %v1297_v62, %v1282_v58 }
 0xba5   :  { %3416 = vtanh.f32 %v3850_v63 }
 0xba6   :  { %3418 = vtanh.f32 %v3852_v5  ;;  %v1299_v2 = vpop.permute.xlu0 %1298  ;;  %v1576_v57 = vrot.slane %v3852_v5, 7 }
 0xba7   :  { %v3856_v6 = vadd.f32 %v1299_v2, %v1283_v0 }
 0xba9   :  { %3420 = vtanh.f32 %v3856_v6  ;;  %v1577_v62 = vrot.slane %v3856_v6, 7 }
 0xbaf   :  { %v3417_v60 = vpop.eup %3416 }
 0xbb0   :  { %v3419_v4 = vpop.eup %3418  ;;  %1189 = vrot.lane.b32.xlu1 %v3417_v60, %s3532_s4 }
 0xbb1   :  { %1308 = vrot.lane.b32.xlu0 %v3419_v4, %s3532_s4 }
 0xbb3   :  { %v3421_v3 = vpop.eup %3420 }
 0xbb4   :  { %1310 = vrot.lane.b32.xlu1 %v3421_v3, %s3532_s4 }
 0xc22   :  { %v1190_v8 = vpop.permute.xlu1 %1189 }
 0xc23   :  { %v1309_v9 = vpop.permute.xlu0 %1308  ;;  %v3862_v10 = vmul.f32 %v1190_v8, %v1175_v44 }
 0xc24   :  { %v1314_v13 = vmul.f32 %v1309_v9, %v1274_v46 }
 0xc25   :  { %1317 = vrot.lane.b32.xlu0 %v3862_v10, %s3533_s11 }
 0xc26   :  { %v1311_v14 = vpop.permute.xlu1 %1310  ;;  %v1393_v18 = vrot.slane %v1314_v13, 3 }
 0xc27   :  { %v1315_v17 = vmul.f32 %v1311_v14, %v1275_v53 }
 0xc29   :  { %v1394_v19 = vrot.slane %v1315_v17, 2 }
 0xc2b   :  { %v1395_v22 = vsel %vm496_vm8, %v1394_v19, %v1393_v18 }
 0xc2c   :  { %1396 = vrot.lane.b32.xlu1 %v1395_v22, %s3533_s11 }
 0xc97   :  { %v1318_v24 = vpop.permute.xlu0 %1317 }
 0xc98   :  { %3061 = vmatmul.mubr.msk.f32.vlgmr.msra.gmra.mrb[12].mxu0 %vm222_vm7, %v1318_v24 }
 0xc99   :  { %3294 = vmatpush3.bf16.msra.mxu0 %v3630_v21  ;;  %3082 = vmatprep.mubr.msk.f32.mxu0 %vm3531_vm6, %v3529_v11 }
 0xc9a   :  { %3295 = vmatprep.subr.bf16.mxu0 %v3530_v20 }
 0xc9d   :  { %3297 = vmatpush3.bf16.msra.mxu0 %v3640_v27 }
 0xc9e   :  { %v1397_v25 = vpop.permute.xlu1 %1396  ;;  %3304 = vmatprep.subr.bf16.mxu0 %v3530_v20 }
 0xc9f   :  { %3072 = vmatmul.mubr.msk.f32.vlgmr.msra.gmra.mrb[12].mxu1 %vm222_vm7, %v1397_v25 }
 0xca0   :  { %3083 = vmatmul.mubr.msk.f32.vlgmr.msra.gmra.mrb[14].mxu0 %vm222_vm7, %v1397_v25  ;;  %3300 = vmatpush3.bf16.msra.mxu1 %v3679_v7 }
 0xca1   :  { %3301 = vmatprep.subr.bf16.mxu1 %v3530_v20  ;;  %3093 = vmatprep.mubr.msk.f32.mxu1 %vm3531_vm6, %v3529_v11 }
 0xca2   :  { %3306 = vmatpush3.bf16.msra.mxu0 %v3687_v12  ;;  %3104 = vmatprep.mubr.msk.f32.mxu0 %vm3531_vm6, %v3529_v11 }
 0xca3   :  { %3307 = vmatprep.subr.bf16.mxu0 %v3530_v20 }
 0xca4   :  { %3303 = vmatpush3.bf16.msra.mxu1 %v3696_v15 }
 0xca5   :  { %3310 = vmatprep.subr.bf16.mxu1 %v3530_v20 }
 0xca6   :  { %3309 = vmatpush3.bf16.msra.mxu0 %v3701_v16 }
 0xca7   :  { %3316 = vmatprep.subr.bf16.mxu0 %v3530_v20 }
 0xd6b   :  { %v1387_v26 = vpop.f32.mrb[12].mxu0 }
 0xd6c   :  { %v3062_v28 = vpop.f32.mrb[13].mxu0 }
 0xd72   :  { %v1466_v29 = vpop.f32.mrb[12].mxu1 }
 0xd73   :  { %v1467_v30 = vadd.f32 %v1466_v29, %v1387_v26  ;;  %v1557_v32 = vpop.f32.mrb[14].mxu0  ;;  %v3073_v33 = vpop.f32.mrb[13].mxu1 }
 0xd74   :  { %v1562_v34 = vrot.slane %v1557_v32, 4  ;;  %v1563_v35 = vrot.slane %v1557_v32, 5  ;;  %v3084_v36 = vpop.f32.mrb[15].mxu0 }
 0xd75   :  { %v1470_v37 = vadd.f32 %v3735_v31, %v1467_v30 }
 0xd76   :  { %v1566_v38 = vadd.f32 %v1562_v34, %v3665_v49  ;;  %v1567_v39 = vadd.f32 %v1563_v35, %v3663_v47 }
 0xd77   :  { %3422 = vtanh.f32 %v1470_v37 }
 0xd78   :  { %3424 = vtanh.f32 %v1566_v38 }
 0xd79   :  { %3426 = vtanh.f32 %v1567_v39 }
 0xd81   :  { %v3423_v40 = vpop.eup %3422 }
 0xd82   :  { %v3425_v41 = vpop.eup %3424  ;;  %1476 = vrot.lane.b32.xlu0 %v3423_v40, %s3532_s4  ;;  %v1472_v43 = vmul.f32 0.5, %v3423_v40 }
 0xd83   :  { %1584 = vrot.lane.b32.xlu1 %v3425_v41, %s3532_s4  ;;  %v3427_v42 = vpop.eup %3426  ;;  %v1570_v44 = vmul.f32 0.5, %v3425_v41 }
 0xd84   :  { %v1473_v45 = vadd.f32 0.5, %v1472_v43  ;;  %v1571_v46 = vmul.f32 0.5, %v3427_v42 }
 0xd85   :  { %v1572_v50 = vadd.f32 0.5, %v1570_v44 }
 0xd86   :  { %1586 = vrot.lane.b32.xlu0 %v3427_v42, %s3532_s4  ;;  %v1573_v54 = vadd.f32 0.5, %v1571_v46  ;;  %v1474_v58 = vmul.f32 %v1473_v45, %v3850_v63 }
 0xd87   :  { %v1580_v61 = vmul.f32 %v1576_v57, %v1572_v50 }
 0xd88   :  { %v1581_v4 = vmul.f32 %v1577_v62, %v1573_v54 }
 0xdf4   :  { %v1477_v48 = vpop.permute.xlu0 %1476 }
 0xdf5   :  { %v1479_v51 = vmul.f32 %v1477_v48, %v1473_v45  ;;  %v1585_v52 = vpop.permute.xlu1 %1584 }
 0xdf6   :  { %v1590_v53 = vmul.f32 %v1585_v52, %v1572_v50 }
 0xdf7   :  { %1481 = vrot.lane.b32.xlu1 %v1479_v51, %s3533_s11 }
 0xdf8   :  { %1594 = vrot.lane.b32.xlu0 %v1590_v53, %s3533_s11  ;;  %v1587_v55 = vpop.permute.xlu0 %1586 }
 0xdf9   :  { %v1591_v56 = vmul.f32 %v1587_v55, %v1573_v54 }
 0xdfb   :  { %1596 = vrot.lane.b32.xlu1 %v1591_v56, %s3533_s11 }
 0xe69   :  { %v1482_v59 = vpop.permute.xlu1 %1481 }
 0xe6a   :  { %v3901_v0 = vadd.f32 %v1482_v59, %v1474_v58  ;;  %v1595_v2 = vpop.permute.xlu0 %1594 }
 0xe6b   :  { %v3903_v60 = vadd.f32 %v1595_v2, %v1580_v61 }
 0xe6c   :  { %3428 = vtanh.f32 %v3901_v0 }
 0xe6d   :  { %3430 = vtanh.f32 %v3903_v60  ;;  %v1597_v3 = vpop.permute.xlu1 %1596  ;;  %v1874_v59 = vrot.slane %v3903_v60, 7 }
 0xe6e   :  { %v3907_v8 = vadd.f32 %v1597_v3, %v1581_v4 }
 0xe70   :  { %3432 = vtanh.f32 %v3907_v8  ;;  %v1875_v4 = vrot.slane %v3907_v8, 7 }
 0xe76   :  { %v3429_v63 = vpop.eup %3428 }
 0xe77   :  { %v3431_v5 = vpop.eup %3430  ;;  %1487 = vrot.lane.b32.xlu0 %v3429_v63, %s3532_s4 }
 0xe78   :  { %1606 = vrot.lane.b32.xlu1 %v3431_v5, %s3532_s4 }
 0xe7a   :  { %v3433_v6 = vpop.eup %3432 }
 0xe7b   :  { %1608 = vrot.lane.b32.xlu0 %v3433_v6, %s3532_s4 }
 0xee9   :  { %v1488_v9 = vpop.permute.xlu0 %1487 }
 0xeea   :  { %v3913_v13 = vmul.f32 %v1488_v9, %v1473_v45  ;;  %v1607_v14 = vpop.permute.xlu1 %1606 }
 0xeeb   :  { %v1612_v17 = vmul.f32 %v1607_v14, %v1572_v50 }
 0xeec   :  { %1615 = vrot.lane.b32.xlu1 %v3913_v13, %s3533_s11 }
 0xeed   :  { %v1609_v18 = vpop.permute.xlu0 %1608  ;;  %v1691_v22 = vrot.slane %v1612_v17, 4 }
 0xeee   :  { %v1613_v19 = vmul.f32 %v1609_v18, %v1573_v54 }
 0xef0   :  { %v1692_v24 = vrot.slane %v1613_v19, 3 }
 0xef2   :  { %v1693_v25 = vsel %vm496_vm8, %v1692_v24, %v1691_v22 }
 0xef3   :  { %1694 = vrot.lane.b32.xlu0 %v1693_v25, %s3533_s11 }
 0xf5e   :  { %v1616_v26 = vpop.permute.xlu1 %1615 }
 0xf5f   :  { %3094 = vmatmul.mubr.msk.f32.vlgmr.msra.gmra.mrb[14].mxu1 %vm222_vm7, %v1616_v26 }
 0xf60   :  { %3312 = vmatpush3.bf16.msra.mxu1 %v3630_v21  ;;  %3115 = vmatprep.mubr.msk.f32.mxu1 %vm3531_vm6, %v3529_v11 }
 0xf61   :  { %3313 = vmatprep.subr.bf16.mxu1 %v3530_v20 }
 0xf64   :  { %3315 = vmatpush3.bf16.msra.mxu1 %v3640_v27 }
 0xf65   :  { %v1695_v28 = vpop.permute.xlu0 %1694  ;;  %3322 = vmatprep.subr.bf16.mxu1 %v3530_v20 }
 0xf66   :  { %3105 = vmatmul.mubr.msk.f32.vlgmr.msra.gmra.mrb[16].mxu0 %vm222_vm7, %v1695_v28 }
 0xf67   :  { %3116 = vmatmul.mubr.msk.f32.vlgmr.msra.gmra.mrb[16].mxu1 %vm222_vm7, %v1695_v28  ;;  %3318 = vmatpush3.bf16.msra.mxu0 %v3679_v7 }
 0xf68   :  { %3319 = vmatprep.subr.bf16.mxu0 %v3530_v20  ;;  %3126 = vmatprep.mubr.msk.f32.mxu0 %vm3531_vm6, %v3529_v11 }
 0xf69   :  { %3324 = vmatpush3.bf16.msra.mxu1 %v3687_v12  ;;  %3137 = vmatprep.mubr.msk.f32.mxu1 %vm3531_vm6, %v3529_v11 }
 0xf6a   :  { %3325 = vmatprep.subr.bf16.mxu1 %v3530_v20 }
 0xf6b   :  { %3321 = vmatpush3.bf16.msra.mxu0 %v3696_v15 }
 0xf6c   :  { %3328 = vmatprep.subr.bf16.mxu0 %v3530_v20 }
 0xf6d   :  { %3327 = vmatpush3.bf16.msra.mxu1 %v3701_v16 }
 0xf6e   :  { %3334 = vmatprep.subr.bf16.mxu1 %v3530_v20 }
0x1032   :  { %v1685_v29 = vpop.f32.mrb[14].mxu1 }
0x1033   :  { %v3095_v30 = vpop.f32.mrb[15].mxu1 }
0x1039   :  { %v1764_v32 = vpop.f32.mrb[16].mxu0 }
0x103a   :  { %v1765_v33 = vadd.f32 %v1764_v32, %v1685_v29  ;;  %v1855_v34 = vpop.f32.mrb[16].mxu1  ;;  %v3106_v35 = vpop.f32.mrb[17].mxu0 }
0x103b   :  { %v1860_v36 = vrot.slane %v1855_v34, 3  ;;  %v1861_v37 = vrot.slane %v1855_v34, 4  ;;  %v3117_v38 = vpop.f32.mrb[17].mxu1 }
0x103c   :  { %v1768_v39 = vadd.f32 %v3735_v31, %v1765_v33 }
0x103d   :  { %v1864_v40 = vadd.f32 %v1860_v36, %v3665_v49  ;;  %v1865_v41 = vadd.f32 %v1861_v37, %v3663_v47 }
0x103e   :  { %3434 = vtanh.f32 %v1768_v39 }
0x103f   :  { %3436 = vtanh.f32 %v1864_v40 }
0x1040   :  { %3438 = vtanh.f32 %v1865_v41 }
0x1048   :  { %v3435_v42 = vpop.eup %3434 }
0x1049   :  { %v3437_v43 = vpop.eup %3436  ;;  %1774 = vrot.lane.b32.xlu1 %v3435_v42, %s3532_s4  ;;  %v1770_v45 = vmul.f32 0.5, %v3435_v42 }
0x104a   :  { %1882 = vrot.lane.b32.xlu0 %v3437_v43, %s3532_s4  ;;  %v3439_v44 = vpop.eup %3438  ;;  %v1868_v46 = vmul.f32 0.5, %v3437_v43 }
0x104b   :  { %v1771_v48 = vadd.f32 0.5, %v1770_v45  ;;  %v1869_v50 = vmul.f32 0.5, %v3439_v44 }
0x104c   :  { %v1870_v51 = vadd.f32 0.5, %v1868_v46 }
0x104d   :  { %1884 = vrot.lane.b32.xlu1 %v3439_v44, %s3532_s4  ;;  %v1871_v56 = vadd.f32 0.5, %v1869_v50  ;;  %v1772_v61 = vmul.f32 %v1771_v48, %v3901_v0 }
0x104e   :  { %v1878_v62 = vmul.f32 %v1874_v59, %v1870_v51 }
0x104f   :  { %v1879_v6 = vmul.f32 %v1875_v4, %v1871_v56 }
0x10bb   :  { %v1775_v52 = vpop.permute.xlu1 %1774 }
0x10bc   :  { %v1883_v53 = vpop.permute.xlu0 %1882  ;;  %v1777_v54 = vmul.f32 %v1775_v52, %v1771_v48 }
0x10bd   :  { %v1888_v55 = vmul.f32 %v1883_v53, %v1870_v51 }
0x10be   :  { %1779 = vrot.lane.b32.xlu0 %v1777_v54, %s3533_s11 }
0x10bf   :  { %1892 = vrot.lane.b32.xlu1 %v1888_v55, %s3533_s11  ;;  %v1885_v57 = vpop.permute.xlu1 %1884 }
0x10c0   :  { %v1889_v58 = vmul.f32 %v1885_v57, %v1871_v56 }
0x10c2   :  { %1894 = vrot.lane.b32.xlu0 %v1889_v58, %s3533_s11 }
0x1130   :  { %v1780_v2 = vpop.permute.xlu0 %1779 }
0x1131   :  { %v1893_v3 = vpop.permute.xlu1 %1892  ;;  %v3952_v63 = vadd.f32 %v1780_v2, %v1772_v61 }
0x1132   :  { %v3954_v5 = vadd.f32 %v1893_v3, %v1878_v62 }
0x1133   :  { %3440 = vtanh.f32 %v3952_v63 }
0x1134   :  { %3442 = vtanh.f32 %v3954_v5  ;;  %v1895_v9 = vpop.permute.xlu0 %1894  ;;  %v2172_v62 = vrot.slane %v3954_v5, 7 }
0x1135   :  { %v3958_v14 = vadd.f32 %v1895_v9, %v1879_v6 }
0x1137   :  { %3444 = vtanh.f32 %v3958_v14  ;;  %v2173_v6 = vrot.slane %v3958_v14, 7 }
0x113d   :  { %v3441_v0 = vpop.eup %3440 }
0x113e   :  { %v3443_v60 = vpop.eup %3442  ;;  %1785 = vrot.lane.b32.xlu1 %v3441_v0, %s3532_s4 }
0x113f   :  { %1904 = vrot.lane.b32.xlu0 %v3443_v60, %s3532_s4 }
0x1141   :  { %v3445_v8 = vpop.eup %3444 }
0x1142   :  { %1906 = vrot.lane.b32.xlu1 %v3445_v8, %s3532_s4 }
0x11b0   :  { %v1786_v17 = vpop.permute.xlu1 %1785 }
0x11b1   :  { %v1905_v18 = vpop.permute.xlu0 %1904  ;;  %v1788_v19 = vmul.f32 %v1786_v17, %v1771_v48 }
0x11b2   :  { %v1910_v22 = vmul.f32 %v1905_v18, %v1870_v51 }
0x11b3   :  { %1913 = vrot.lane.b32.xlu0 %v1788_v19, %s3533_s11 }
0x11b4   :  { %v1907_v24 = vpop.permute.xlu1 %1906  ;;  %v1989_v26 = vrot.slane %v1910_v22, 5 }
0x11b5   :  { %v1911_v25 = vmul.f32 %v1907_v24, %v1871_v56 }
0x11b7   :  { %v1990_v28 = vrot.slane %v1911_v25, 4 }
0x11b9   :  { %v1991_v29 = vsel %vm496_vm8, %v1990_v28, %v1989_v26 }
0x11ba   :  { %1992 = vrot.lane.b32.xlu1 %v1991_v29, %s3533_s11 }
0x1225   :  { %v3967_v30 = vpop.permute.xlu0 %1913 }
0x1226   :  { %3127 = vmatmul.mubr.msk.f32.vlgmr.msra.gmra.mrb[18].mxu0 %vm222_vm7, %v3967_v30 }
0x1227   :  { %3330 = vmatpush3.bf16.msra.mxu0 %v3630_v21  ;;  %3148 = vmatprep.mubr.msk.f32.mxu0 %vm3531_vm6, %v3529_v11 }
0x1228   :  { %3331 = vmatprep.subr.bf16.mxu0 %v3530_v20 }
0x122b   :  { %3333 = vmatpush3.bf16.msra.mxu0 %v3640_v27 }
0x122c   :  { %v1993_v32 = vpop.permute.xlu1 %1992  ;;  %3340 = vmatprep.subr.bf16.mxu0 %v3530_v20 }
0x122d   :  { %3138 = vmatmul.mubr.msk.f32.vlgmr.msra.gmra.mrb[18].mxu1 %vm222_vm7, %v1993_v32 }
0x122e   :  { %3149 = vmatmul.mubr.msk.f32.vlgmr.msra.gmra.mrb[20].mxu0 %vm222_vm7, %v1993_v32  ;;  %3336 = vmatpush3.bf16.msra.mxu1 %v3679_v7 }
0x122f   :  { %3337 = vmatprep.subr.bf16.mxu1 %v3530_v20  ;;  %3159 = vmatprep.mubr.msk.f32.mxu1 %vm3531_vm6, %v3529_v11 }
0x1230   :  { %3342 = vmatpush3.bf16.msra.mxu0 %v3687_v12  ;;  %3170 = vmatprep.mubr.msk.f32.mxu0 %vm3531_vm6, %v3529_v11 }
0x1231   :  { %3343 = vmatprep.subr.bf16.mxu0 %v3530_v20 }
0x1232   :  { %3339 = vmatpush3.bf16.msra.mxu1 %v3696_v15 }
0x1233   :  { %3346 = vmatprep.subr.bf16.mxu1 %v3530_v20 }
0x1234   :  { %3345 = vmatpush3.bf16.msra.mxu0 %v3701_v16 }
0x1235   :  { %3352 = vmatprep.subr.bf16.mxu0 %v3530_v20 }
0x12f9   :  { %v1983_v33 = vpop.f32.mrb[18].mxu0 }
0x12fa   :  { %v3128_v34 = vpop.f32.mrb[19].mxu0 }
0x1300   :  { %v2062_v35 = vpop.f32.mrb[18].mxu1 }
0x1301   :  { %v2063_v36 = vadd.f32 %v2062_v35, %v1983_v33  ;;  %v2153_v37 = vpop.f32.mrb[20].mxu0  ;;  %v3139_v38 = vpop.f32.mrb[19].mxu1 }
0x1302   :  { %v2158_v39 = vrot.slane %v2153_v37, 2  ;;  %v2159_v40 = vrot.slane %v2153_v37, 3  ;;  %v3150_v41 = vpop.f32.mrb[21].mxu0 }
0x1303   :  { %v2066_v42 = vadd.f32 %v3735_v31, %v2063_v36 }
0x1304   :  { %v2162_v43 = vadd.f32 %v2158_v39, %v3665_v49  ;;  %v2163_v44 = vadd.f32 %v2159_v40, %v3663_v47 }
0x1305   :  { %3446 = vtanh.f32 %v2066_v42 }
0x1306   :  { %3448 = vtanh.f32 %v2162_v43 }
0x1307   :  { %3450 = vtanh.f32 %v2163_v44 }
0x130f   :  { %v3447_v45 = vpop.eup %3446 }
0x1310   :  { %v3449_v46 = vpop.eup %3448  ;;  %2072 = vrot.lane.b32.xlu0 %v3447_v45, %s3532_s4  ;;  %v2068_v50 = vmul.f32 0.5, %v3447_v45 }
0x1311   :  { %2180 = vrot.lane.b32.xlu1 %v3449_v46, %s3532_s4  ;;  %v3451_v48 = vpop.eup %3450  ;;  %v2166_v51 = vmul.f32 0.5, %v3449_v46 }
0x1312   :  { %v2069_v52 = vadd.f32 0.5, %v2068_v50  ;;  %v2167_v31 = vmul.f32 0.5, %v3451_v48 }
0x1313   :  { %v2168_v54 = vadd.f32 0.5, %v2166_v51 }
0x1314   :  { %2182 = vrot.lane.b32.xlu0 %v3451_v48, %s3532_s4  ;;  %v2169_v58 = vadd.f32 0.5, %v2167_v31  ;;  %v2070_v2 = vmul.f32 %v2069_v52, %v3952_v63 }
0x1315   :  { %v2176_v3 = vmul.f32 %v2172_v62, %v2168_v54 }
0x1316   :  { %v2177_v8 = vmul.f32 %v2173_v6, %v2169_v58 }
0x1382   :  { %v2073_v53 = vpop.permute.xlu0 %2072 }
0x1383   :  { %v2075_v55 = vmul.f32 %v2073_v53, %v2069_v52  ;;  %v2181_v56 = vpop.permute.xlu1 %2180 }
0x1384   :  { %v2186_v57 = vmul.f32 %v2181_v56, %v2168_v54 }
0x1385   :  { %2077 = vrot.lane.b32.xlu1 %v2075_v55, %s3533_s11 }
0x1386   :  { %2190 = vrot.lane.b32.xlu0 %v2186_v57, %s3533_s11  ;;  %v2183_v59 = vpop.permute.xlu0 %2182 }
0x1387   :  { %v2187_v61 = vmul.f32 %v2183_v59, %v2169_v58 }
0x1389   :  { %2192 = vrot.lane.b32.xlu1 %v2187_v61, %s3533_s11 }
0x13f7   :  { %v2078_v4 = vpop.permute.xlu1 %2077 }
0x13f8   :  { %v4003_v9 = vadd.f32 %v2078_v4, %v2070_v2  ;;  %v2191_v0 = vpop.permute.xlu0 %2190 }
0x13f9   :  { %v4005_v60 = vadd.f32 %v2191_v0, %v2176_v3 }
0x13fa   :  { %3452 = vtanh.f32 %v4003_v9 }
0x13fb   :  { %3454 = vtanh.f32 %v4005_v60  ;;  %v2193_v17 = vpop.permute.xlu1 %2192  ;;  %v2470_v55 = vrot.slane %v4005_v60, 7 }
0x13fc   :  { %v4009_v18 = vadd.f32 %v2193_v17, %v2177_v8 }
0x13fe   :  { %3456 = vtanh.f32 %v4009_v18  ;;  %v2471_v56 = vrot.slane %v4009_v18, 7 }
0x1404   :  { %v3453_v63 = vpop.eup %3452 }
0x1405   :  { %v3455_v5 = vpop.eup %3454  ;;  %2083 = vrot.lane.b32.xlu0 %v3453_v63, %s3532_s4 }
0x1406   :  { %2202 = vrot.lane.b32.xlu1 %v3455_v5, %s3532_s4 }
0x1408   :  { %v3457_v14 = vpop.eup %3456 }
0x1409   :  { %2204 = vrot.lane.b32.xlu0 %v3457_v14, %s3532_s4 }
0x1477   :  { %v2084_v19 = vpop.permute.xlu0 %2083 }
0x1478   :  { %v4015_v22 = vmul.f32 %v2084_v19, %v2069_v52  ;;  %v2203_v24 = vpop.permute.xlu1 %2202 }
0x1479   :  { %v2208_v25 = vmul.f32 %v2203_v24, %v2168_v54 }
0x147a   :  { %2211 = vrot.lane.b32.xlu1 %v4015_v22, %s3533_s11 }
0x147b   :  { %v2205_v26 = vpop.permute.xlu0 %2204  ;;  %v2287_v29 = vrot.slane %v2208_v25, 6 }
0x147c   :  { %v2209_v28 = vmul.f32 %v2205_v26, %v2169_v58 }
0x147e   :  { %v2288_v32 = vrot.slane %v2209_v28, 5 }
0x1480   :  { %v2289_v33 = vsel %vm496_vm8, %v2288_v32, %v2287_v29 }
0x1481   :  { %2290 = vrot.lane.b32.xlu0 %v2289_v33, %s3533_s11 }
0x14ec   :  { %v2212_v34 = vpop.permute.xlu1 %2211 }
0x14ed   :  { %3160 = vmatmul.mubr.msk.f32.vlgmr.msra.gmra.mrb[20].mxu1 %vm222_vm7, %v2212_v34 }
0x14ee   :  { %3348 = vmatpush3.bf16.msra.mxu1 %v3630_v21  ;;  %3181 = vmatprep.mubr.msk.f32.mxu1 %vm3531_vm6, %v3529_v11 }
0x14ef   :  { %3349 = vmatprep.subr.bf16.mxu1 %v3530_v20 }
0x14f2   :  { %3351 = vmatpush3.bf16.msra.mxu1 %v3640_v27 }
0x14f3   :  { %v2291_v35 = vpop.permute.xlu0 %2290  ;;  %3358 = vmatprep.subr.bf16.mxu1 %v3530_v20 }
0x14f4   :  { %3171 = vmatmul.mubr.msk.f32.vlgmr.msra.gmra.mrb[22].mxu0 %vm222_vm7, %v2291_v35 }
0x14f5   :  { %3182 = vmatmul.mubr.msk.f32.vlgmr.msra.gmra.mrb[22].mxu1 %vm222_vm7, %v2291_v35  ;;  %3354 = vmatpush3.bf16.msra.mxu0 %v3679_v7 }
0x14f6   :  { %3360 = vmatpush3.bf16.msra.mxu1 %v3687_v12  ;;  %3355 = vmatprep.subr.bf16.mxu0 %v3530_v20 }
0x14f7   :  { %3361 = vmatprep.subr.bf16.mxu1 %v3530_v20  ;;  %3203 = vmatprep.mubr.msk.f32.mxu1 %vm3531_vm6, %v3529_v11 }
0x14f8   :  { %3192 = vmatprep.mubr.msk.f32.mxu0 %vm3531_vm6, %v3529_v11  ;;  %v4045_v11 = vld [vmem:[%s4114_s7 + $0x1] ss:$0 sm:$0xff]  ;;  %s3534_s7 = smov 96  }
0x14f9   :  { %3357 = vmatpush3.bf16.msra.mxu0 %v3696_v15 }
0x14fa   :  { %3363 = vmatpush3.bf16.msra.mxu1 %v3701_v16 }
0x15c0   :  { %v2281_v21 = vpop.f32.mrb[20].mxu1 }
0x15c1   :  { %v3161_v27 = vpop.f32.mrb[21].mxu1 }
0x15c7   :  { %v2360_v36 = vpop.f32.mrb[22].mxu0 }
0x15c8   :  { %v2361_v7 = vadd.f32 %v2360_v36, %v2281_v21  ;;  %v2451_v37 = vpop.f32.mrb[22].mxu1  ;;  %v3172_v12 = vpop.f32.mrb[23].mxu0 }
0x15c9   :  { %v2456_v38 = vrot.slane %v2451_v37, 1  ;;  %v2457_v39 = vrot.slane %v2451_v37, 2  ;;  %v3183_v40 = vpop.f32.mrb[23].mxu1 }
0x15ca   :  { %v2364_v15 = vadd.f32 %v4045_v11, %v2361_v7 }
0x15cb   :  { %v2460_v20 = vadd.f32 %v2456_v38, %v3665_v49  ;;  %v2461_v41 = vadd.f32 %v2457_v39, %v3663_v47 }
0x15cd   :  { %3458 = vtanh.f32 %v2460_v20 }
0x15ce   :  { %3460 = vtanh.f32 %v2461_v41 }
0x15cf   :  { %3462 = vtanh.f32 %v2364_v15 }
0x15d7   :  { %v3459_v16 = vpop.eup %3458 }
0x15d8   :  { %v3461_v42 = vpop.eup %3460  ;;  %2478 = vrot.lane.b32.xlu1 %v3459_v16, %s3532_s4  ;;  %v2464_v47 = vmul.f32 0.5, %v3459_v16 }
0x15d9   :  { %2480 = vrot.lane.b32.xlu0 %v3461_v42, %s3532_s4  ;;  %v3463_v43 = vpop.eup %3462  ;;  %v2465_v49 = vmul.f32 0.5, %v3461_v42 }
0x15da   :  { %v2466_v44 = vadd.f32 0.5, %v2464_v47  ;;  %v2366_v45 = vmul.f32 0.5, %v3463_v43 }
0x15db   :  { %v2467_v46 = vadd.f32 0.5, %v2465_v49 }
0x15dc   :  { %2370 = vrot.lane.b32.xlu1 %v3463_v43, %s3532_s4  ;;  %v2367_v31 = vadd.f32 0.5, %v2366_v45  ;;  %v2474_v57 = vmul.f32 %v2470_v55, %v2466_v44 }
0x15dd   :  { %v2475_v59 = vmul.f32 %v2471_v56, %v2467_v46 }
0x15de   :  { %v2368_v4 = vmul.f32 %v2367_v31, %v4003_v9 }
0x164a   :  { %v2479_v48 = vpop.permute.xlu1 %2478 }
0x164b   :  { %v2481_v50 = vpop.permute.xlu0 %2480  ;;  %v2484_v51 = vmul.f32 %v2479_v48, %v2466_v44 }
0x164c   :  { %v2485_v52 = vmul.f32 %v2481_v50, %v2467_v46 }
0x164d   :  { %2488 = vrot.lane.b32.xlu0 %v2484_v51, %s3533_s11 }
0x164e   :  { %2490 = vrot.lane.b32.xlu1 %v2485_v52, %s3533_s11  ;;  %v2371_v53 = vpop.permute.xlu1 %2370 }
0x164f   :  { %v2373_v54 = vmul.f32 %v2371_v53, %v2367_v31 }
0x1651   :  { %2375 = vrot.lane.b32.xlu0 %v2373_v54, %s3533_s11 }
0x16bf   :  { %v2489_v58 = vpop.permute.xlu0 %2488 }
0x16c0   :  { %v4056_v61 = vadd.f32 %v2489_v58, %v2474_v57  ;;  %v2491_v62 = vpop.permute.xlu1 %2490 }
0x16c1   :  { %v4058_v2 = vadd.f32 %v2491_v62, %v2475_v59 }
0x16c2   :  { %3464 = vtanh.f32 %v4056_v61 }
0x16c3   :  { %3466 = vtanh.f32 %v4058_v2  ;;  %v2376_v3 = vpop.permute.xlu0 %2375 }
0x16c4   :  { %v2378_v6 = vadd.f32 %v2376_v3, %v2368_v4 }
0x16c6   :  { %3468 = vtanh.f32 %v2378_v6 }
0x16cc   :  { %v3465_v0 = vpop.eup %3464 }
0x16cd   :  { %v3467_v60 = vpop.eup %3466  ;;  %2500 = vrot.lane.b32.xlu1 %v3465_v0, %s3532_s4 }
0x16ce   :  { %2502 = vrot.lane.b32.xlu0 %v3467_v60, %s3532_s4 }
0x16d0   :  { %v3469_v8 = vpop.eup %3468 }
0x16d1   :  { %2381 = vrot.lane.b32.xlu1 %v3469_v8, %s3532_s4 }
0x173f   :  { %v2501_v17 = vpop.permute.xlu1 %2500 }
0x1740   :  { %v2506_v18 = vmul.f32 %v2501_v17, %v2466_v44  ;;  %v2503_v63 = vpop.permute.xlu0 %2502 }
0x1741   :  { %v2507_v5 = vmul.f32 %v2503_v63, %v2467_v46 }
0x1742   :  { %v2585_v14 = vrot.slane %v2506_v18, 7 }
0x1743   :  { %v2586_v9 = vrot.slane %v2507_v5, 6  ;;  %v2382_v19 = vpop.permute.xlu1 %2381  ;;  %v2717_v15 = vrot.slane %v2507_v5, 7 }
0x1744   :  { %v2384_v24 = vmul.f32 %v2382_v19, %v2367_v31 }
0x1745   :  { %v2587_v25 = vsel %vm496_vm8, %v2586_v9, %v2585_v14 }
0x1746   :  { %2588 = vrot.lane.b32.xlu1 %v2587_v25, %s3533_s11  ;;  %2509 = vrot.lane.b32.xlu0 %v2384_v24, %s3533_s11 }
0x17b8   :  { %v2589_v26 = vpop.permute.xlu1 %2588  ;;  %v2510_v28 = vpop.permute.xlu0 %2509 }
0x17b9   :  { %3204 = vmatmul.mubr.msk.f32.vlgmr.msra.gmra.mrb[24].mxu1 %vm222_vm7, %v2589_v26  ;;  %3193 = vmatmul.mubr.msk.f32.vlgmr.msra.gmra.mrb[24].mxu0 %vm222_vm7, %v2510_v28 }
0x188c   :  { %v2658_v29 = vpop.f32.mrb[24].mxu1  ;;  %v2579_v32 = vpop.f32.mrb[24].mxu0 }
0x188d   :  { %v2659_v33 = vadd.f32 %v2658_v29, %v2579_v32  ;;  %v3205_v34 = vpop.f32.mrb[25].mxu1  ;;  %v3194_v35 = vpop.f32.mrb[25].mxu0 }
0x188f   :  { %v2662_v21 = vadd.f32 %v4045_v11, %v2659_v33 }
0x1891   :  { %3470 = vtanh.f32 %v2662_v21 }
0x189b   :  { %v3471_v27 = vpop.eup %3470 }
0x189c   :  { %2668 = vrot.lane.b32.xlu0 %v3471_v27, %s3532_s4  ;;  %v2664_v36 = vmul.f32 0.5, %v3471_v27 }
0x189e   :  { %v2665_v7 = vadd.f32 0.5, %v2664_v36 }
0x18a0   :  { %v2666_v38 = vmul.f32 %v2665_v7, %v2378_v6 }
0x190e   :  { %v2669_v37 = vpop.permute.xlu0 %2668 }
0x190f   :  { %v2671_v12 = vmul.f32 %v2669_v37, %v2665_v7 }
0x1911   :  { %2673 = vrot.lane.b32.xlu1 %v2671_v12, %s3533_s11 }
0x1983   :  { %v2674_v39 = vpop.permute.xlu1 %2673 }
0x1984   :  { %v2676_v40 = vadd.f32 %v2674_v39, %v2666_v38 }
0x1986   :  { %3472 = vtanh.f32 %v2676_v40 }
0x1990   :  { %v3473_v20 = vpop.eup %3472 }
0x1991   :  { %2679 = vrot.lane.b32.xlu0 %v3473_v20, %s3532_s4 }
0x1995   :  { %2684 = vrot.lane.b32.xlu0 %v3811_v1, %s3532_s4 }
0x1999   :  { %2687 = vrot.lane.b32.xlu0 %v3862_v10, %s3534_s7 }
0x199d   :  { %2718 = vrot.lane.b32.xlu0 %v2506_v18, %s3533_s11 }
0x1a03   :  { %v2680_v41 = vpop.permute.xlu0 %2679 }
0x1a04   :  { %v2682_v11 = vmul.f32 %v2680_v41, %v2665_v7 }
0x1a06   :  { %2732 = vrot.lane.b32.xlu1 %v2682_v11, %s3533_s11 }
0x1a07   :  { %v2685_v16 = vpop.permute.xlu0 %2684 }
0x1a08   :  { %v2697_v49 = vsel %vm222_vm7, %v3763_v23, %v2685_v16  ;;  %v2726_v23 = vrot.slane %v4058_v2, 7 }
0x1a0a   :  { %2691 = vrot.lane.b32.xlu1 %v4015_v22, %s3532_s4 }
0x1a0b   :  { %v2688_v10 = vpop.permute.xlu0 %2687 }
0x1a0c   :  { %v2699_v22 = vsel %vm2698_vm9, %v2697_v49, %v2688_v10 }
0x1a0d   :  { %v2701_v48 = vsel %vm2700_vm10, %v2699_v22, %v3913_v13 }
0x1a0e   :  { %2694 = vrot.lane.b32.xlu1 %v2384_v24, %s3534_s7 }
0x1a0f   :  { %v2719_v52 = vpop.permute.xlu0 %2718 }
0x1a10   :  { %v2729_v53 = vsel %vm222_vm7, %v2719_v52, %v4056_v61 }
0x1a12   :  { %2720 = vrot.lane.b32.xlu1 %v2717_v15, %s3533_s11 }
0x1a78   :  { %v2733_v42 = vpop.permute.xlu1 %2732 }
0x1a79   :  { %v2735_v1 = vsel %vm222_vm7, %v2733_v42, %v2676_v40 }
0x1a7a   :  { %v2737_v43 = vrot.slane %v2735_v1, 1 }
0x1a7c   :  { %2738 = vrot.lane.b32.xlu0 %v2737_v43, %s3532_s4  ;;  %v2692_v47 = vpop.permute.xlu1 %2691 }
0x1a7d   :  { %v2702_v44 = vsel %vm222_vm7, %v3967_v30, %v2692_v47 }
0x1a80   :  { %v2695_v45 = vpop.permute.xlu1 %2694 }
0x1a81   :  { %v2703_v46 = vsel %vm2698_vm9, %v2702_v44, %v2695_v45 }
0x1a82   :  { %v2704_v50 = vsel %vm2700_vm10, %v2703_v46, %v2682_v11 }
0x1a83   :  { %v2707_v51 = vcombine.low %v2701_v48, %v2704_v50 }
0x1a84   :  { %v2721_v31 = vpop.permute.xlu1 %2720 }
0x1a85   :  { %2793 = vst.sshfl [vmem:[%s4115_s8] sm:$0x33 pattern:$0x76325410] %v2707_v51  ;;  %v2730_v30 = vsel %vm222_vm7, %v2721_v31, %v2726_v23 }
0x1aee   :  { %v2739_v54 = vpop.permute.xlu0 %2738 }
0x1aef   :  { %v2741_v55 = vsel %vm2698_vm9, %v2729_v53, %v2739_v54  ;;  %v2742_v13 = vsel %vm2698_vm9, %v2730_v30, %v2739_v54 }
0x1af0   :  { %2743 = vst [vmem:[%s4116_s9 - $0x7] sm:$0x80] %v2741_v55  ;;  %2744 = vst [vmem:[%s4116_s9 + $0x1] sm:$0x1] %v2742_v13 }
0x1af1   :  { %2753 = vsyncpa [#allocation3], 1 }
0x1af2   :  { %2754 = vsyncpa [#allocation5], 1 }

</bundles_post_ra>
